<compile_context>
chip_gen: v7x
topology: tpu7x:2x2x1
jax: 0.10.0
libtpu: 0.0.40
codegen_flags: <defaults>
</compile_context>

<pallas_src>
import functools

import jax
import jax.numpy as jnp
from jax import lax
from jax.experimental import pallas as pl
from jax.experimental.pallas import tpu as pltpu


def lstm_kernel(x_ref, w_ih_ref, w_hh_ref, b_ref, out_ref, seq_buf, xw_buf,
                *, hidden, num_layers):
    """All LSTM layers x all timesteps for one batch tile (single grid step)."""
    b_blk, T, in_max = x_ref.shape

    # Layer-0 input sequence. x is already zero-padded past embedding_dim in the wrapper,
    # so pad columns of seq_buf start out zero; for deeper layers any stale columns beyond
    # `hidden` are multiplied by the zero-padded w_ih rows and never affect the math.
    seq_buf[...] = x_ref[...].astype(seq_buf.dtype)

    h_last = jnp.zeros((b_blk, hidden), jnp.float32)
    for layer in range(num_layers):          # static unroll: L is tiny
        w_ih = w_ih_ref[layer]               # (in_max, 4H)
        w_hh = w_hh_ref[layer]               # (H, 4H)
        b = b_ref[layer]                     # (1, 4H)

        # Hoisted input-side projection + bias for the whole sequence: one
        # (b_blk*T, in_max) x (in_max, 4H) MXU matmul instead of T tiny ones.
        seq2d = seq_buf[...].reshape(b_blk * T, in_max)
        xw = jnp.dot(seq2d, w_ih, preferred_element_type=jnp.float32) + b
        xw_buf[...] = xw.reshape(b_blk, T, 4 * hidden)

        def step(t, carry):
            h, c = carry
            gates = xw_buf[:, t, :] + jnp.dot(
                h.astype(w_hh.dtype), w_hh, preferred_element_type=jnp.float32)

            # One EUP sigmoid pass over the full (b_blk, 4H) vreg; tanh only on g.
            sg = jax.nn.sigmoid(gates)
            i = sg[:, 0 * hidden:1 * hidden]
            f = sg[:, 1 * hidden:2 * hidden]
            o = sg[:, 3 * hidden:4 * hidden]
            g = jnp.tanh(gates[:, 2 * hidden:3 * hidden])

            c_new = f * c + i * g
            h_new = o * jnp.tanh(c_new)

            # This layer's output at time t becomes the next layer's input at time t.
            seq_buf[:, t, :hidden] = h_new.astype(seq_buf.dtype)
            return h_new, c_new

        h0 = jnp.zeros((b_blk, hidden), jnp.float32)
        c0 = jnp.zeros((b_blk, hidden), jnp.float32)
        h_last, _ = lax.fori_loop(0, T, step, (h0, c0), unroll=True)

    out_ref[...] = h_last.astype(out_ref.dtype)


def auto_regressive_forward(x, w_ih_t, w_hh_t, bias, *, hidden,
                            operand_dtype=jnp.float32):
    """x: (B, T, E) -> (B, hidden). Equivalent to PyTorch lstm(x)[0][:, -1, :]."""
    B, T, E = x.shape
    L, in_max, four_h = w_ih_t.shape
    assert four_h == 4 * hidden
    assert in_max >= E

    # Zero-pad the embedding dim to in_max so every layer shares one seq buffer; the extra
    # w_ih rows are zero so the padding never changes the result.
    x_pad = jnp.pad(x, ((0, 0), (0, 0), (0, in_max - E))).astype(operand_dtype)
    w_ih_t = w_ih_t.astype(operand_dtype)
    w_hh_t = w_hh_t.astype(operand_dtype)
    bias = bias.astype(jnp.float32)

    kernel = functools.partial(lstm_kernel, hidden=hidden, num_layers=L)

    # Single "parallel" grid axis over batch tiles (shards across TensorCores on v7x);
    # with the demo batch size a single tile covers the whole batch.
    batch_block = B
    grid = (pl.cdiv(B, batch_block),)

    return pl.pallas_call(
        kernel,
        out_shape=jax.ShapeDtypeStruct((B, hidden), jnp.float32),
        grid_spec=pltpu.PrefetchScalarGridSpec(
            num_scalar_prefetch=0,
            grid=grid,
            in_specs=[
                pl.BlockSpec((batch_block, T, in_max), lambda b: (b, 0, 0)),
                pl.BlockSpec((L, in_max, 4 * hidden), lambda b: (0, 0, 0)),
                pl.BlockSpec((L, hidden, 4 * hidden), lambda b: (0, 0, 0)),
                pl.BlockSpec((L, 1, 4 * hidden), lambda b: (0, 0, 0)),
            ],
            out_specs=pl.BlockSpec((batch_block, hidden), lambda b: (b, 0)),
            scratch_shapes=[
                pltpu.VMEM((batch_block, T, in_max), operand_dtype),    # layer I/O sequence
                pltpu.VMEM((batch_block, T, 4 * hidden), jnp.float32),  # hoisted x-projection
            ],
        ),
        compiler_params=pltpu.CompilerParams(
            dimension_semantics=("parallel",)),
    )(x_pad, w_ih_t, w_hh_t, bias)


def lstm_reference(x, w_ih_list, w_hh_list, b_ih_list, b_hh_list, hidden):
    """Pure-JAX reference matching torch.nn.LSTM (batch_first, eval mode)."""
    B, T, _ = x.shape
    inp = x
    for wi, wh, bi, bh in zip(w_ih_list, w_hh_list, b_ih_list, b_hh_list):
        h = jnp.zeros((B, hidden), jnp.float32)
        c = jnp.zeros((B, hidden), jnp.float32)
        outs = []
        for t in range(T):
            gates = inp[:, t, :] @ wi.T + h @ wh.T + bi + bh
            i = jax.nn.sigmoid(gates[:, 0 * hidden:1 * hidden])
            f = jax.nn.sigmoid(gates[:, 1 * hidden:2 * hidden])
            g = jnp.tanh(gates[:, 2 * hidden:3 * hidden])
            o = jax.nn.sigmoid(gates[:, 3 * hidden:4 * hidden])
            c = f * c + i * g
            h = o * jnp.tanh(c)
            outs.append(h)
        inp = jnp.stack(outs, axis=1)
    return inp[:, -1, :]


if __name__ == "__main__":
    # config: embedding_dim=24, context_dim=32, num_lstm_layers=2, lstm_dropout=0.0
    B, T = 2, 8
    E, H, L = 24, 32, 2
    IN_MAX = max(E, H)

    key = jax.random.PRNGKey(0)
    k_x, *k_w = jax.random.split(key, 1 + 4 * L)
    bound = 1.0 / jnp.sqrt(jnp.float32(H))  # PyTorch nn.LSTM default init range

    x = jax.random.normal(k_x, (B, T, E), dtype=jnp.float32)

    w_ih_list, w_hh_list, b_ih_list, b_hh_list = [], [], [], []
    for l in range(L):
        in_dim = E if l == 0 else H
        w_ih_list.append(jax.random.uniform(k_w[4 * l + 0], (4 * H, in_dim),
                                            minval=-bound, maxval=bound))
        w_hh_list.append(jax.random.uniform(k_w[4 * l + 1], (4 * H, H),
                                            minval=-bound, maxval=bound))
        b_ih_list.append(jax.random.uniform(k_w[4 * l + 2], (4 * H,),
                                            minval=-bound, maxval=bound))
        b_hh_list.append(jax.random.uniform(k_w[4 * l + 3], (4 * H,),
                                            minval=-bound, maxval=bound))

    # Stack (pre-transposed, zero-padded on the input dim) for the kernel.
    w_ih_t = jnp.stack([
        jnp.pad(w.T, ((0, IN_MAX - w.shape[1]), (0, 0))) for w in w_ih_list
    ], axis=0)                                        # (L, IN_MAX, 4H)
    w_hh_t = jnp.stack([w.T for w in w_hh_list], 0)   # (L, H, 4H)
    bias = jnp.stack([(bi + bh)[None, :] for bi, bh in zip(b_ih_list, b_hh_list)], 0)  # (L,1,4H)

    # operand_dtype=jnp.float32 for parity with the f32 reference; pass jnp.bfloat16 on
    # v6e/v7x in production for native-rate MXU operands (gate math stays f32 inside).
    out = auto_regressive_forward(x, w_ih_t, w_hh_t, bias, hidden=H,
                                  operand_dtype=jnp.float32)
    out = jax.block_until_ready(out)

    ref = lstm_reference(x, w_ih_list, w_hh_list, b_ih_list, b_hh_list, H)
    assert out.shape == (B, H), out.shape
    assert jnp.allclose(out, ref, atol=1e-4, rtol=1e-4), float(jnp.max(jnp.abs(out - ref)))

    print("KERNEL_OK")
</pallas_src>

<mosaic_0001>
module attributes {stable_mosaic.version = 11 : i64} {
  func.func @lstm_kernel(%arg0: i32, %arg1: memref<2x8x32xf32, #tpu.memory_space<vmem>>, %arg2: memref<2x32x128xf32, #tpu.memory_space<vmem>>, %arg3: memref<2x32x128xf32, #tpu.memory_space<vmem>>, %arg4: memref<2x1x128xf32, #tpu.memory_space<vmem>>, %arg5: memref<2x32xf32, #tpu.memory_space<vmem>>, %arg6: memref<2x8x32xf32, #tpu.memory_space<vmem>>, %arg7: memref<2x8x128xf32, #tpu.memory_space<vmem>>) attributes {dimension_semantics = [#tpu.dimension_semantics<parallel>], iteration_bounds = array<i64: 1>, scalar_prefetch = 0 : i64, scratch_operands = 2 : i64, tpu.core_type = #tpu.core_type<tc>, window_params = [{transform_indices = @transform_0, window_bounds = array<i64: 2, 8, 32>}, {pipeline_mode = #tpu.pipeline_mode<synchronous>, transform_indices = @transform_1, window_bounds = array<i64: 2, 32, 128>}, {pipeline_mode = #tpu.pipeline_mode<synchronous>, transform_indices = @transform_2, window_bounds = array<i64: 2, 32, 128>}, {pipeline_mode = #tpu.pipeline_mode<synchronous>, transform_indices = @transform_3, window_bounds = array<i64: 2, 1, 128>}, {transform_indices = @transform_4, window_bounds = array<i64: 2, 32>}]} {
    %c0 = arith.constant 0 : index
    %c0_0 = arith.constant 0 : index
    %c0_1 = arith.constant 0 : index
    %0 = vector.load %arg1[%c0, %c0_0, %c0_1] : memref<2x8x32xf32, #tpu.memory_space<vmem>>, vector<2x8x32xf32>
    %c0_2 = arith.constant 0 : index
    %c0_3 = arith.constant 0 : index
    %c0_4 = arith.constant 0 : index
    %1 = vector.load %arg6[%c0_2, %c0_3, %c0_4] : memref<2x8x32xf32, #tpu.memory_space<vmem>>, vector<2x8x32xf32>
    tpu.vector_store %arg6[%c0_2, %c0_3, %c0_4], %0 {strides = array<i32>} : memref<2x8x32xf32, #tpu.memory_space<vmem>>, vector<2x8x32xf32>,
    %c0_5 = arith.constant 0 : index
    %c0_6 = arith.constant 0 : index
    %c0_7 = arith.constant 0 : index
    %2 = vector.load %arg2[%c0_5, %c0_6, %c0_7] : memref<2x32x128xf32, #tpu.memory_space<vmem>>, vector<1x32x128xf32>
    %3 = vector.shape_cast %2 : vector<1x32x128xf32> to vector<32x128xf32>
    %c0_8 = arith.constant 0 : index
    %c0_9 = arith.constant 0 : index
    %c0_10 = arith.constant 0 : index
    %4 = vector.load %arg3[%c0_8, %c0_9, %c0_10] : memref<2x32x128xf32, #tpu.memory_space<vmem>>, vector<1x32x128xf32>
    %5 = vector.shape_cast %4 : vector<1x32x128xf32> to vector<32x128xf32>
    %c0_11 = arith.constant 0 : index
    %c0_12 = arith.constant 0 : index
    %c0_13 = arith.constant 0 : index
    %6 = vector.load %arg4[%c0_11, %c0_12, %c0_13] : memref<2x1x128xf32, #tpu.memory_space<vmem>>, vector<1x1x128xf32>
    %7 = vector.shape_cast %6 : vector<1x1x128xf32> to vector<1x128xf32>
    %c0_14 = arith.constant 0 : index
    %c0_15 = arith.constant 0 : index
    %c0_16 = arith.constant 0 : index
    %8 = vector.load %arg6[%c0_14, %c0_15, %c0_16] : memref<2x8x32xf32, #tpu.memory_space<vmem>>, vector<2x8x32xf32>
    %9 = vector.shape_cast %8 : vector<2x8x32xf32> to vector<16x32xf32>
    %cst = arith.constant dense<0.000000e+00> : vector<16x128xf32>
    %10 = tpu.matmul %9, %3, %cst {dimension_numbers = #tpu.dot_dimension_numbers<[1], [0], [0], [1], [0, 0, 1, 1], [], []>} : vector<16x32xf32>, vector<32x128xf32>, vector<16x128xf32> -> vector<16x128xf32>
    %11 = vector.broadcast %7 : vector<1x128xf32> to vector<16x128xf32>
    %12 = arith.addf %10, %11 : vector<16x128xf32>
    %13 = vector.shape_cast %12 : vector<16x128xf32> to vector<2x8x128xf32>
    %c0_17 = arith.constant 0 : index
    %c0_18 = arith.constant 0 : index
    %c0_19 = arith.constant 0 : index
    %14 = vector.load %arg7[%c0_17, %c0_18, %c0_19] : memref<2x8x128xf32, #tpu.memory_space<vmem>>, vector<2x8x128xf32>
    tpu.vector_store %arg7[%c0_17, %c0_18, %c0_19], %13 {strides = array<i32>} : memref<2x8x128xf32, #tpu.memory_space<vmem>>, vector<2x8x128xf32>,
    %cst_20 = arith.constant 0.000000e+00 : f32
    %15 = vector.broadcast %cst_20 : f32 to vector<2x32xf32>
    %cst_21 = arith.constant 0.000000e+00 : f32
    %16 = vector.broadcast %cst_21 : f32 to vector<2x32xf32>
    %c0_i32 = arith.constant 0 : i32
    %c0_22 = arith.constant 0 : index
    %17 = arith.index_cast %c0_i32 : i32 to index
    %c0_23 = arith.constant 0 : index
    %18 = vector.load %arg7[%c0_22, %17, %c0_23] : memref<2x8x128xf32, #tpu.memory_space<vmem>>, vector<2x1x128xf32>
    %19 = vector.shape_cast %18 : vector<2x1x128xf32> to vector<2x128xf32>
    %cst_24 = arith.constant dense<0.000000e+00> : vector<2x128xf32>
    %20 = tpu.matmul %15, %5, %cst_24 {dimension_numbers = #tpu.dot_dimension_numbers<[1], [0], [0], [1], [0, 0, 1, 1], [], []>} : vector<2x32xf32>, vector<32x128xf32>, vector<2x128xf32> -> vector<2x128xf32>
    %21 = arith.addf %19, %20 : vector<2x128xf32>
    %22 = arith.negf %21 : vector<2x128xf32>
    %23 = math.exp %22 : vector<2x128xf32>
    %cst_25 = arith.constant 1.000000e+00 : f32
    %24 = vector.broadcast %cst_25 : f32 to vector<2x128xf32>
    %25 = arith.addf %24, %23 : vector<2x128xf32>
    %26 = arith.divf %24, %25 : vector<2x128xf32>
    %27 = vector.extract_strided_slice %26 {offsets = [0, 0], sizes = [2, 32], strides = [1, 1]} : vector<2x128xf32> to vector<2x32xf32>
    %28 = vector.extract_strided_slice %26 {offsets = [0, 32], sizes = [2, 32], strides = [1, 1]} : vector<2x128xf32> to vector<2x32xf32>
    %29 = vector.extract_strided_slice %26 {offsets = [0, 96], sizes = [2, 32], strides = [1, 1]} : vector<2x128xf32> to vector<2x32xf32>
    %30 = vector.extract_strided_slice %21 {offsets = [0, 64], sizes = [2, 32], strides = [1, 1]} : vector<2x128xf32> to vector<2x32xf32>
    %31 = math.tanh %30 : vector<2x32xf32>
    %32 = arith.mulf %28, %16 : vector<2x32xf32>
    %33 = arith.mulf %27, %31 : vector<2x32xf32>
    %34 = arith.addf %32, %33 : vector<2x32xf32>
    %35 = math.tanh %34 : vector<2x32xf32>
    %36 = arith.mulf %29, %35 : vector<2x32xf32>
    %c0_26 = arith.constant 0 : index
    %37 = arith.index_cast %c0_i32 : i32 to index
    %c0_27 = arith.constant 0 : index
    %38 = vector.load %arg6[%c0_26, %37, %c0_27] : memref<2x8x32xf32, #tpu.memory_space<vmem>>, vector<2x1x32xf32>
    %39 = vector.shape_cast %38 : vector<2x1x32xf32> to vector<2x32xf32>
    %40 = vector.shape_cast %36 : vector<2x32xf32> to vector<2x1x32xf32>
    tpu.vector_store %arg6[%c0_26, %37, %c0_27], %40 {strides = array<i32>} : memref<2x8x32xf32, #tpu.memory_space<vmem>>, vector<2x1x32xf32>,
    %c1_i32 = arith.constant 1 : i32
    %c0_28 = arith.constant 0 : index
    %41 = arith.index_cast %c1_i32 : i32 to index
    %c0_29 = arith.constant 0 : index
    %42 = vector.load %arg7[%c0_28, %41, %c0_29] : memref<2x8x128xf32, #tpu.memory_space<vmem>>, vector<2x1x128xf32>
    %43 = vector.shape_cast %42 : vector<2x1x128xf32> to vector<2x128xf32>
    %cst_30 = arith.constant dense<0.000000e+00> : vector<2x128xf32>
    %44 = tpu.matmul %36, %5, %cst_30 {dimension_numbers = #tpu.dot_dimension_numbers<[1], [0], [0], [1], [0, 0, 1, 1], [], []>} : vector<2x32xf32>, vector<32x128xf32>, vector<2x128xf32> -> vector<2x128xf32>
    %45 = arith.addf %43, %44 : vector<2x128xf32>
    %46 = arith.negf %45 : vector<2x128xf32>
    %47 = math.exp %46 : vector<2x128xf32>
    %cst_31 = arith.constant 1.000000e+00 : f32
    %48 = vector.broadcast %cst_31 : f32 to vector<2x128xf32>
    %49 = arith.addf %48, %47 : vector<2x128xf32>
    %50 = arith.divf %48, %49 : vector<2x128xf32>
    %51 = vector.extract_strided_slice %50 {offsets = [0, 0], sizes = [2, 32], strides = [1, 1]} : vector<2x128xf32> to vector<2x32xf32>
    %52 = vector.extract_strided_slice %50 {offsets = [0, 32], sizes = [2, 32], strides = [1, 1]} : vector<2x128xf32> to vector<2x32xf32>
    %53 = vector.extract_strided_slice %50 {offsets = [0, 96], sizes = [2, 32], strides = [1, 1]} : vector<2x128xf32> to vector<2x32xf32>
    %54 = vector.extract_strided_slice %45 {offsets = [0, 64], sizes = [2, 32], strides = [1, 1]} : vector<2x128xf32> to vector<2x32xf32>
    %55 = math.tanh %54 : vector<2x32xf32>
    %56 = arith.mulf %52, %34 : vector<2x32xf32>
    %57 = arith.mulf %51, %55 : vector<2x32xf32>
    %58 = arith.addf %56, %57 : vector<2x32xf32>
    %59 = math.tanh %58 : vector<2x32xf32>
    %60 = arith.mulf %53, %59 : vector<2x32xf32>
    %c0_32 = arith.constant 0 : index
    %61 = arith.index_cast %c1_i32 : i32 to index
    %c0_33 = arith.constant 0 : index
    %62 = vector.load %arg6[%c0_32, %61, %c0_33] : memref<2x8x32xf32, #tpu.memory_space<vmem>>, vector<2x1x32xf32>
    %63 = vector.shape_cast %62 : vector<2x1x32xf32> to vector<2x32xf32>
    %64 = vector.shape_cast %60 : vector<2x32xf32> to vector<2x1x32xf32>
    tpu.vector_store %arg6[%c0_32, %61, %c0_33], %64 {strides = array<i32>} : memref<2x8x32xf32, #tpu.memory_space<vmem>>, vector<2x1x32xf32>,
    %c2_i32 = arith.constant 2 : i32
    %c0_34 = arith.constant 0 : index
    %65 = arith.index_cast %c2_i32 : i32 to index
    %c0_35 = arith.constant 0 : index
    %66 = vector.load %arg7[%c0_34, %65, %c0_35] : memref<2x8x128xf32, #tpu.memory_space<vmem>>, vector<2x1x128xf32>
    %67 = vector.shape_cast %66 : vector<2x1x128xf32> to vector<2x128xf32>
    %cst_36 = arith.constant dense<0.000000e+00> : vector<2x128xf32>
    %68 = tpu.matmul %60, %5, %cst_36 {dimension_numbers = #tpu.dot_dimension_numbers<[1], [0], [0], [1], [0, 0, 1, 1], [], []>} : vector<2x32xf32>, vector<32x128xf32>, vector<2x128xf32> -> vector<2x128xf32>
    %69 = arith.addf %67, %68 : vector<2x128xf32>
    %70 = arith.negf %69 : vector<2x128xf32>
    %71 = math.exp %70 : vector<2x128xf32>
    %cst_37 = arith.constant 1.000000e+00 : f32
    %72 = vector.broadcast %cst_37 : f32 to vector<2x128xf32>
    %73 = arith.addf %72, %71 : vector<2x128xf32>
    %74 = arith.divf %72, %73 : vector<2x128xf32>
    %75 = vector.extract_strided_slice %74 {offsets = [0, 0], sizes = [2, 32], strides = [1, 1]} : vector<2x128xf32> to vector<2x32xf32>
    %76 = vector.extract_strided_slice %74 {offsets = [0, 32], sizes = [2, 32], strides = [1, 1]} : vector<2x128xf32> to vector<2x32xf32>
    %77 = vector.extract_strided_slice %74 {offsets = [0, 96], sizes = [2, 32], strides = [1, 1]} : vector<2x128xf32> to vector<2x32xf32>
    %78 = vector.extract_strided_slice %69 {offsets = [0, 64], sizes = [2, 32], strides = [1, 1]} : vector<2x128xf32> to vector<2x32xf32>
    %79 = math.tanh %78 : vector<2x32xf32>
    %80 = arith.mulf %76, %58 : vector<2x32xf32>
    %81 = arith.mulf %75, %79 : vector<2x32xf32>
    %82 = arith.addf %80, %81 : vector<2x32xf32>
    %83 = math.tanh %82 : vector<2x32xf32>
    %84 = arith.mulf %77, %83 : vector<2x32xf32>
    %c0_38 = arith.constant 0 : index
    %85 = arith.index_cast %c2_i32 : i32 to index
    %c0_39 = arith.constant 0 : index
    %86 = vector.load %arg6[%c0_38, %85, %c0_39] : memref<2x8x32xf32, #tpu.memory_space<vmem>>, vector<2x1x32xf32>
    %87 = vector.shape_cast %86 : vector<2x1x32xf32> to vector<2x32xf32>
    %88 = vector.shape_cast %84 : vector<2x32xf32> to vector<2x1x32xf32>
    tpu.vector_store %arg6[%c0_38, %85, %c0_39], %88 {strides = array<i32>} : memref<2x8x32xf32, #tpu.memory_space<vmem>>, vector<2x1x32xf32>,
    %c3_i32 = arith.constant 3 : i32
    %c0_40 = arith.constant 0 : index
    %89 = arith.index_cast %c3_i32 : i32 to index
    %c0_41 = arith.constant 0 : index
    %90 = vector.load %arg7[%c0_40, %89, %c0_41] : memref<2x8x128xf32, #tpu.memory_space<vmem>>, vector<2x1x128xf32>
    %91 = vector.shape_cast %90 : vector<2x1x128xf32> to vector<2x128xf32>
    %cst_42 = arith.constant dense<0.000000e+00> : vector<2x128xf32>
    %92 = tpu.matmul %84, %5, %cst_42 {dimension_numbers = #tpu.dot_dimension_numbers<[1], [0], [0], [1], [0, 0, 1, 1], [], []>} : vector<2x32xf32>, vector<32x128xf32>, vector<2x128xf32> -> vector<2x128xf32>
    %93 = arith.addf %91, %92 : vector<2x128xf32>
    %94 = arith.negf %93 : vector<2x128xf32>
    %95 = math.exp %94 : vector<2x128xf32>
    %cst_43 = arith.constant 1.000000e+00 : f32
    %96 = vector.broadcast %cst_43 : f32 to vector<2x128xf32>
    %97 = arith.addf %96, %95 : vector<2x128xf32>
    %98 = arith.divf %96, %97 : vector<2x128xf32>
    %99 = vector.extract_strided_slice %98 {offsets = [0, 0], sizes = [2, 32], strides = [1, 1]} : vector<2x128xf32> to vector<2x32xf32>
    %100 = vector.extract_strided_slice %98 {offsets = [0, 32], sizes = [2, 32], strides = [1, 1]} : vector<2x128xf32> to vector<2x32xf32>
    %101 = vector.extract_strided_slice %98 {offsets = [0, 96], sizes = [2, 32], strides = [1, 1]} : vector<2x128xf32> to vector<2x32xf32>
    %102 = vector.extract_strided_slice %93 {offsets = [0, 64], sizes = [2, 32], strides = [1, 1]} : vector<2x128xf32> to vector<2x32xf32>
    %103 = math.tanh %102 : vector<2x32xf32>
    %104 = arith.mulf %100, %82 : vector<2x32xf32>
    %105 = arith.mulf %99, %103 : vector<2x32xf32>
    %106 = arith.addf %104, %105 : vector<2x32xf32>
    %107 = math.tanh %106 : vector<2x32xf32>
    %108 = arith.mulf %101, %107 : vector<2x32xf32>
    %c0_44 = arith.constant 0 : index
    %109 = arith.index_cast %c3_i32 : i32 to index
    %c0_45 = arith.constant 0 : index
    %110 = vector.load %arg6[%c0_44, %109, %c0_45] : memref<2x8x32xf32, #tpu.memory_space<vmem>>, vector<2x1x32xf32>
    %111 = vector.shape_cast %110 : vector<2x1x32xf32> to vector<2x32xf32>
    %112 = vector.shape_cast %108 : vector<2x32xf32> to vector<2x1x32xf32>
    tpu.vector_store %arg6[%c0_44, %109, %c0_45], %112 {strides = array<i32>} : memref<2x8x32xf32, #tpu.memory_space<vmem>>, vector<2x1x32xf32>,
    %c4_i32 = arith.constant 4 : i32
    %c0_46 = arith.constant 0 : index
    %113 = arith.index_cast %c4_i32 : i32 to index
    %c0_47 = arith.constant 0 : index
    %114 = vector.load %arg7[%c0_46, %113, %c0_47] : memref<2x8x128xf32, #tpu.memory_space<vmem>>, vector<2x1x128xf32>
    %115 = vector.shape_cast %114 : vector<2x1x128xf32> to vector<2x128xf32>
    %cst_48 = arith.constant dense<0.000000e+00> : vector<2x128xf32>
    %116 = tpu.matmul %108, %5, %cst_48 {dimension_numbers = #tpu.dot_dimension_numbers<[1], [0], [0], [1], [0, 0, 1, 1], [], []>} : vector<2x32xf32>, vector<32x128xf32>, vector<2x128xf32> -> vector<2x128xf32>
    %117 = arith.addf %115, %116 : vector<2x128xf32>
    %118 = arith.negf %117 : vector<2x128xf32>
    %119 = math.exp %118 : vector<2x128xf32>
    %cst_49 = arith.constant 1.000000e+00 : f32
    %120 = vector.broadcast %cst_49 : f32 to vector<2x128xf32>
    %121 = arith.addf %120, %119 : vector<2x128xf32>
    %122 = arith.divf %120, %121 : vector<2x128xf32>
    %123 = vector.extract_strided_slice %122 {offsets = [0, 0], sizes = [2, 32], strides = [1, 1]} : vector<2x128xf32> to vector<2x32xf32>
    %124 = vector.extract_strided_slice %122 {offsets = [0, 32], sizes = [2, 32], strides = [1, 1]} : vector<2x128xf32> to vector<2x32xf32>
    %125 = vector.extract_strided_slice %122 {offsets = [0, 96], sizes = [2, 32], strides = [1, 1]} : vector<2x128xf32> to vector<2x32xf32>
    %126 = vector.extract_strided_slice %117 {offsets = [0, 64], sizes = [2, 32], strides = [1, 1]} : vector<2x128xf32> to vector<2x32xf32>
    %127 = math.tanh %126 : vector<2x32xf32>
    %128 = arith.mulf %124, %106 : vector<2x32xf32>
    %129 = arith.mulf %123, %127 : vector<2x32xf32>
    %130 = arith.addf %128, %129 : vector<2x32xf32>
    %131 = math.tanh %130 : vector<2x32xf32>
    %132 = arith.mulf %125, %131 : vector<2x32xf32>
    %c0_50 = arith.constant 0 : index
    %133 = arith.index_cast %c4_i32 : i32 to index
    %c0_51 = arith.constant 0 : index
    %134 = vector.load %arg6[%c0_50, %133, %c0_51] : memref<2x8x32xf32, #tpu.memory_space<vmem>>, vector<2x1x32xf32>
    %135 = vector.shape_cast %134 : vector<2x1x32xf32> to vector<2x32xf32>
    %136 = vector.shape_cast %132 : vector<2x32xf32> to vector<2x1x32xf32>
    tpu.vector_store %arg6[%c0_50, %133, %c0_51], %136 {strides = array<i32>} : memref<2x8x32xf32, #tpu.memory_space<vmem>>, vector<2x1x32xf32>,
    %c5_i32 = arith.constant 5 : i32
    %c0_52 = arith.constant 0 : index
    %137 = arith.index_cast %c5_i32 : i32 to index
    %c0_53 = arith.constant 0 : index
    %138 = vector.load %arg7[%c0_52, %137, %c0_53] : memref<2x8x128xf32, #tpu.memory_space<vmem>>, vector<2x1x128xf32>
    %139 = vector.shape_cast %138 : vector<2x1x128xf32> to vector<2x128xf32>
    %cst_54 = arith.constant dense<0.000000e+00> : vector<2x128xf32>
    %140 = tpu.matmul %132, %5, %cst_54 {dimension_numbers = #tpu.dot_dimension_numbers<[1], [0], [0], [1], [0, 0, 1, 1], [], []>} : vector<2x32xf32>, vector<32x128xf32>, vector<2x128xf32> -> vector<2x128xf32>
    %141 = arith.addf %139, %140 : vector<2x128xf32>
    %142 = arith.negf %141 : vector<2x128xf32>
    %143 = math.exp %142 : vector<2x128xf32>
    %cst_55 = arith.constant 1.000000e+00 : f32
    %144 = vector.broadcast %cst_55 : f32 to vector<2x128xf32>
    %145 = arith.addf %144, %143 : vector<2x128xf32>
    %146 = arith.divf %144, %145 : vector<2x128xf32>
    %147 = vector.extract_strided_slice %146 {offsets = [0, 0], sizes = [2, 32], strides = [1, 1]} : vector<2x128xf32> to vector<2x32xf32>
    %148 = vector.extract_strided_slice %146 {offsets = [0, 32], sizes = [2, 32], strides = [1, 1]} : vector<2x128xf32> to vector<2x32xf32>
    %149 = vector.extract_strided_slice %146 {offsets = [0, 96], sizes = [2, 32], strides = [1, 1]} : vector<2x128xf32> to vector<2x32xf32>
    %150 = vector.extract_strided_slice %141 {offsets = [0, 64], sizes = [2, 32], strides = [1, 1]} : vector<2x128xf32> to vector<2x32xf32>
    %151 = math.tanh %150 : vector<2x32xf32>
    %152 = arith.mulf %148, %130 : vector<2x32xf32>
    %153 = arith.mulf %147, %151 : vector<2x32xf32>
    %154 = arith.addf %152, %153 : vector<2x32xf32>
    %155 = math.tanh %154 : vector<2x32xf32>
    %156 = arith.mulf %149, %155 : vector<2x32xf32>
    %c0_56 = arith.constant 0 : index
    %157 = arith.index_cast %c5_i32 : i32 to index
    %c0_57 = arith.constant 0 : index
    %158 = vector.load %arg6[%c0_56, %157, %c0_57] : memref<2x8x32xf32, #tpu.memory_space<vmem>>, vector<2x1x32xf32>
    %159 = vector.shape_cast %158 : vector<2x1x32xf32> to vector<2x32xf32>
    %160 = vector.shape_cast %156 : vector<2x32xf32> to vector<2x1x32xf32>
    tpu.vector_store %arg6[%c0_56, %157, %c0_57], %160 {strides = array<i32>} : memref<2x8x32xf32, #tpu.memory_space<vmem>>, vector<2x1x32xf32>,
    %c6_i32 = arith.constant 6 : i32
    %c0_58 = arith.constant 0 : index
    %161 = arith.index_cast %c6_i32 : i32 to index
    %c0_59 = arith.constant 0 : index
    %162 = vector.load %arg7[%c0_58, %161, %c0_59] : memref<2x8x128xf32, #tpu.memory_space<vmem>>, vector<2x1x128xf32>
    %163 = vector.shape_cast %162 : vector<2x1x128xf32> to vector<2x128xf32>
    %cst_60 = arith.constant dense<0.000000e+00> : vector<2x128xf32>
    %164 = tpu.matmul %156, %5, %cst_60 {dimension_numbers = #tpu.dot_dimension_numbers<[1], [0], [0], [1], [0, 0, 1, 1], [], []>} : vector<2x32xf32>, vector<32x128xf32>, vector<2x128xf32> -> vector<2x128xf32>
    %165 = arith.addf %163, %164 : vector<2x128xf32>
    %166 = arith.negf %165 : vector<2x128xf32>
    %167 = math.exp %166 : vector<2x128xf32>
    %cst_61 = arith.constant 1.000000e+00 : f32
    %168 = vector.broadcast %cst_61 : f32 to vector<2x128xf32>
    %169 = arith.addf %168, %167 : vector<2x128xf32>
    %170 = arith.divf %168, %169 : vector<2x128xf32>
    %171 = vector.extract_strided_slice %170 {offsets = [0, 0], sizes = [2, 32], strides = [1, 1]} : vector<2x128xf32> to vector<2x32xf32>
    %172 = vector.extract_strided_slice %170 {offsets = [0, 32], sizes = [2, 32], strides = [1, 1]} : vector<2x128xf32> to vector<2x32xf32>
    %173 = vector.extract_strided_slice %170 {offsets = [0, 96], sizes = [2, 32], strides = [1, 1]} : vector<2x128xf32> to vector<2x32xf32>
    %174 = vector.extract_strided_slice %165 {offsets = [0, 64], sizes = [2, 32], strides = [1, 1]} : vector<2x128xf32> to vector<2x32xf32>
    %175 = math.tanh %174 : vector<2x32xf32>
    %176 = arith.mulf %172, %154 : vector<2x32xf32>
    %177 = arith.mulf %171, %175 : vector<2x32xf32>
    %178 = arith.addf %176, %177 : vector<2x32xf32>
    %179 = math.tanh %178 : vector<2x32xf32>
    %180 = arith.mulf %173, %179 : vector<2x32xf32>
    %c0_62 = arith.constant 0 : index
    %181 = arith.index_cast %c6_i32 : i32 to index
    %c0_63 = arith.constant 0 : index
    %182 = vector.load %arg6[%c0_62, %181, %c0_63] : memref<2x8x32xf32, #tpu.memory_space<vmem>>, vector<2x1x32xf32>
    %183 = vector.shape_cast %182 : vector<2x1x32xf32> to vector<2x32xf32>
    %184 = vector.shape_cast %180 : vector<2x32xf32> to vector<2x1x32xf32>
    tpu.vector_store %arg6[%c0_62, %181, %c0_63], %184 {strides = array<i32>} : memref<2x8x32xf32, #tpu.memory_space<vmem>>, vector<2x1x32xf32>,
    %c7_i32 = arith.constant 7 : i32
    %c0_64 = arith.constant 0 : index
    %185 = arith.index_cast %c7_i32 : i32 to index
    %c0_65 = arith.constant 0 : index
    %186 = vector.load %arg7[%c0_64, %185, %c0_65] : memref<2x8x128xf32, #tpu.memory_space<vmem>>, vector<2x1x128xf32>
    %187 = vector.shape_cast %186 : vector<2x1x128xf32> to vector<2x128xf32>
    %cst_66 = arith.constant dense<0.000000e+00> : vector<2x128xf32>
    %188 = tpu.matmul %180, %5, %cst_66 {dimension_numbers = #tpu.dot_dimension_numbers<[1], [0], [0], [1], [0, 0, 1, 1], [], []>} : vector<2x32xf32>, vector<32x128xf32>, vector<2x128xf32> -> vector<2x128xf32>
    %189 = arith.addf %187, %188 : vector<2x128xf32>
    %190 = arith.negf %189 : vector<2x128xf32>
    %191 = math.exp %190 : vector<2x128xf32>
    %cst_67 = arith.constant 1.000000e+00 : f32
    %192 = vector.broadcast %cst_67 : f32 to vector<2x128xf32>
    %193 = arith.addf %192, %191 : vector<2x128xf32>
    %194 = arith.divf %192, %193 : vector<2x128xf32>
    %195 = vector.extract_strided_slice %194 {offsets = [0, 0], sizes = [2, 32], strides = [1, 1]} : vector<2x128xf32> to vector<2x32xf32>
    %196 = vector.extract_strided_slice %194 {offsets = [0, 32], sizes = [2, 32], strides = [1, 1]} : vector<2x128xf32> to vector<2x32xf32>
    %197 = vector.extract_strided_slice %194 {offsets = [0, 96], sizes = [2, 32], strides = [1, 1]} : vector<2x128xf32> to vector<2x32xf32>
    %198 = vector.extract_strided_slice %189 {offsets = [0, 64], sizes = [2, 32], strides = [1, 1]} : vector<2x128xf32> to vector<2x32xf32>
    %199 = math.tanh %198 : vector<2x32xf32>
    %200 = arith.mulf %196, %178 : vector<2x32xf32>
    %201 = arith.mulf %195, %199 : vector<2x32xf32>
    %202 = arith.addf %200, %201 : vector<2x32xf32>
    %203 = math.tanh %202 : vector<2x32xf32>
    %204 = arith.mulf %197, %203 : vector<2x32xf32>
    %c0_68 = arith.constant 0 : index
    %205 = arith.index_cast %c7_i32 : i32 to index
    %c0_69 = arith.constant 0 : index
    %206 = vector.load %arg6[%c0_68, %205, %c0_69] : memref<2x8x32xf32, #tpu.memory_space<vmem>>, vector<2x1x32xf32>
    %207 = vector.shape_cast %206 : vector<2x1x32xf32> to vector<2x32xf32>
    %208 = vector.shape_cast %204 : vector<2x32xf32> to vector<2x1x32xf32>
    tpu.vector_store %arg6[%c0_68, %205, %c0_69], %208 {strides = array<i32>} : memref<2x8x32xf32, #tpu.memory_space<vmem>>, vector<2x1x32xf32>,
    %c8_i32 = arith.constant 8 : i32
    %c1 = arith.constant 1 : index
    %c0_70 = arith.constant 0 : index
    %c0_71 = arith.constant 0 : index
    %209 = vector.load %arg2[%c1, %c0_70, %c0_71] : memref<2x32x128xf32, #tpu.memory_space<vmem>>, vector<1x32x128xf32>
    %210 = vector.shape_cast %209 : vector<1x32x128xf32> to vector<32x128xf32>
    %c1_72 = arith.constant 1 : index
    %c0_73 = arith.constant 0 : index
    %c0_74 = arith.constant 0 : index
    %211 = vector.load %arg3[%c1_72, %c0_73, %c0_74] : memref<2x32x128xf32, #tpu.memory_space<vmem>>, vector<1x32x128xf32>
    %212 = vector.shape_cast %211 : vector<1x32x128xf32> to vector<32x128xf32>
    %c1_75 = arith.constant 1 : index
    %c0_76 = arith.constant 0 : index
    %c0_77 = arith.constant 0 : index
    %213 = vector.load %arg4[%c1_75, %c0_76, %c0_77] : memref<2x1x128xf32, #tpu.memory_space<vmem>>, vector<1x1x128xf32>
    %214 = vector.shape_cast %213 : vector<1x1x128xf32> to vector<1x128xf32>
    %c0_78 = arith.constant 0 : index
    %c0_79 = arith.constant 0 : index
    %c0_80 = arith.constant 0 : index
    %215 = vector.load %arg6[%c0_78, %c0_79, %c0_80] : memref<2x8x32xf32, #tpu.memory_space<vmem>>, vector<2x8x32xf32>
    %216 = vector.shape_cast %215 : vector<2x8x32xf32> to vector<16x32xf32>
    %cst_81 = arith.constant dense<0.000000e+00> : vector<16x128xf32>
    %217 = tpu.matmul %216, %210, %cst_81 {dimension_numbers = #tpu.dot_dimension_numbers<[1], [0], [0], [1], [0, 0, 1, 1], [], []>} : vector<16x32xf32>, vector<32x128xf32>, vector<16x128xf32> -> vector<16x128xf32>
    %218 = vector.broadcast %214 : vector<1x128xf32> to vector<16x128xf32>
    %219 = arith.addf %217, %218 : vector<16x128xf32>
    %220 = vector.shape_cast %219 : vector<16x128xf32> to vector<2x8x128xf32>
    %c0_82 = arith.constant 0 : index
    %c0_83 = arith.constant 0 : index
    %c0_84 = arith.constant 0 : index
    %221 = vector.load %arg7[%c0_82, %c0_83, %c0_84] : memref<2x8x128xf32, #tpu.memory_space<vmem>>, vector<2x8x128xf32>
    tpu.vector_store %arg7[%c0_82, %c0_83, %c0_84], %220 {strides = array<i32>} : memref<2x8x128xf32, #tpu.memory_space<vmem>>, vector<2x8x128xf32>,
    %cst_85 = arith.constant 0.000000e+00 : f32
    %222 = vector.broadcast %cst_85 : f32 to vector<2x32xf32>
    %cst_86 = arith.constant 0.000000e+00 : f32
    %223 = vector.broadcast %cst_86 : f32 to vector<2x32xf32>
    %c0_i32_87 = arith.constant 0 : i32
    %c0_88 = arith.constant 0 : index
    %224 = arith.index_cast %c0_i32_87 : i32 to index
    %c0_89 = arith.constant 0 : index
    %225 = vector.load %arg7[%c0_88, %224, %c0_89] : memref<2x8x128xf32, #tpu.memory_space<vmem>>, vector<2x1x128xf32>
    %226 = vector.shape_cast %225 : vector<2x1x128xf32> to vector<2x128xf32>
    %cst_90 = arith.constant dense<0.000000e+00> : vector<2x128xf32>
    %227 = tpu.matmul %222, %212, %cst_90 {dimension_numbers = #tpu.dot_dimension_numbers<[1], [0], [0], [1], [0, 0, 1, 1], [], []>} : vector<2x32xf32>, vector<32x128xf32>, vector<2x128xf32> -> vector<2x128xf32>
    %228 = arith.addf %226, %227 : vector<2x128xf32>
    %229 = arith.negf %228 : vector<2x128xf32>
    %230 = math.exp %229 : vector<2x128xf32>
    %cst_91 = arith.constant 1.000000e+00 : f32
    %231 = vector.broadcast %cst_91 : f32 to vector<2x128xf32>
    %232 = arith.addf %231, %230 : vector<2x128xf32>
    %233 = arith.divf %231, %232 : vector<2x128xf32>
    %234 = vector.extract_strided_slice %233 {offsets = [0, 0], sizes = [2, 32], strides = [1, 1]} : vector<2x128xf32> to vector<2x32xf32>
    %235 = vector.extract_strided_slice %233 {offsets = [0, 32], sizes = [2, 32], strides = [1, 1]} : vector<2x128xf32> to vector<2x32xf32>
    %236 = vector.extract_strided_slice %233 {offsets = [0, 96], sizes = [2, 32], strides = [1, 1]} : vector<2x128xf32> to vector<2x32xf32>
    %237 = vector.extract_strided_slice %228 {offsets = [0, 64], sizes = [2, 32], strides = [1, 1]} : vector<2x128xf32> to vector<2x32xf32>
    %238 = math.tanh %237 : vector<2x32xf32>
    %239 = arith.mulf %235, %223 : vector<2x32xf32>
    %240 = arith.mulf %234, %238 : vector<2x32xf32>
    %241 = arith.addf %239, %240 : vector<2x32xf32>
    %242 = math.tanh %241 : vector<2x32xf32>
    %243 = arith.mulf %236, %242 : vector<2x32xf32>
    %c0_92 = arith.constant 0 : index
    %244 = arith.index_cast %c0_i32_87 : i32 to index
    %c0_93 = arith.constant 0 : index
    %245 = vector.load %arg6[%c0_92, %244, %c0_93] : memref<2x8x32xf32, #tpu.memory_space<vmem>>, vector<2x1x32xf32>
    %246 = vector.shape_cast %245 : vector<2x1x32xf32> to vector<2x32xf32>
    %247 = vector.shape_cast %243 : vector<2x32xf32> to vector<2x1x32xf32>
    tpu.vector_store %arg6[%c0_92, %244, %c0_93], %247 {strides = array<i32>} : memref<2x8x32xf32, #tpu.memory_space<vmem>>, vector<2x1x32xf32>,
    %c1_i32_94 = arith.constant 1 : i32
    %c0_95 = arith.constant 0 : index
    %248 = arith.index_cast %c1_i32_94 : i32 to index
    %c0_96 = arith.constant 0 : index
    %249 = vector.load %arg7[%c0_95, %248, %c0_96] : memref<2x8x128xf32, #tpu.memory_space<vmem>>, vector<2x1x128xf32>
    %250 = vector.shape_cast %249 : vector<2x1x128xf32> to vector<2x128xf32>
    %cst_97 = arith.constant dense<0.000000e+00> : vector<2x128xf32>
    %251 = tpu.matmul %243, %212, %cst_97 {dimension_numbers = #tpu.dot_dimension_numbers<[1], [0], [0], [1], [0, 0, 1, 1], [], []>} : vector<2x32xf32>, vector<32x128xf32>, vector<2x128xf32> -> vector<2x128xf32>
    %252 = arith.addf %250, %251 : vector<2x128xf32>
    %253 = arith.negf %252 : vector<2x128xf32>
    %254 = math.exp %253 : vector<2x128xf32>
    %cst_98 = arith.constant 1.000000e+00 : f32
    %255 = vector.broadcast %cst_98 : f32 to vector<2x128xf32>
    %256 = arith.addf %255, %254 : vector<2x128xf32>
    %257 = arith.divf %255, %256 : vector<2x128xf32>
    %258 = vector.extract_strided_slice %257 {offsets = [0, 0], sizes = [2, 32], strides = [1, 1]} : vector<2x128xf32> to vector<2x32xf32>
    %259 = vector.extract_strided_slice %257 {offsets = [0, 32], sizes = [2, 32], strides = [1, 1]} : vector<2x128xf32> to vector<2x32xf32>
    %260 = vector.extract_strided_slice %257 {offsets = [0, 96], sizes = [2, 32], strides = [1, 1]} : vector<2x128xf32> to vector<2x32xf32>
    %261 = vector.extract_strided_slice %252 {offsets = [0, 64], sizes = [2, 32], strides = [1, 1]} : vector<2x128xf32> to vector<2x32xf32>
    %262 = math.tanh %261 : vector<2x32xf32>
    %263 = arith.mulf %259, %241 : vector<2x32xf32>
    %264 = arith.mulf %258, %262 : vector<2x32xf32>
    %265 = arith.addf %263, %264 : vector<2x32xf32>
    %266 = math.tanh %265 : vector<2x32xf32>
    %267 = arith.mulf %260, %266 : vector<2x32xf32>
    %c0_99 = arith.constant 0 : index
    %268 = arith.index_cast %c1_i32_94 : i32 to index
    %c0_100 = arith.constant 0 : index
    %269 = vector.load %arg6[%c0_99, %268, %c0_100] : memref<2x8x32xf32, #tpu.memory_space<vmem>>, vector<2x1x32xf32>
    %270 = vector.shape_cast %269 : vector<2x1x32xf32> to vector<2x32xf32>
    %271 = vector.shape_cast %267 : vector<2x32xf32> to vector<2x1x32xf32>
    tpu.vector_store %arg6[%c0_99, %268, %c0_100], %271 {strides = array<i32>} : memref<2x8x32xf32, #tpu.memory_space<vmem>>, vector<2x1x32xf32>,
    %c2_i32_101 = arith.constant 2 : i32
    %c0_102 = arith.constant 0 : index
    %272 = arith.index_cast %c2_i32_101 : i32 to index
    %c0_103 = arith.constant 0 : index
    %273 = vector.load %arg7[%c0_102, %272, %c0_103] : memref<2x8x128xf32, #tpu.memory_space<vmem>>, vector<2x1x128xf32>
    %274 = vector.shape_cast %273 : vector<2x1x128xf32> to vector<2x128xf32>
    %cst_104 = arith.constant dense<0.000000e+00> : vector<2x128xf32>
    %275 = tpu.matmul %267, %212, %cst_104 {dimension_numbers = #tpu.dot_dimension_numbers<[1], [0], [0], [1], [0, 0, 1, 1], [], []>} : vector<2x32xf32>, vector<32x128xf32>, vector<2x128xf32> -> vector<2x128xf32>
    %276 = arith.addf %274, %275 : vector<2x128xf32>
    %277 = arith.negf %276 : vector<2x128xf32>
    %278 = math.exp %277 : vector<2x128xf32>
    %cst_105 = arith.constant 1.000000e+00 : f32
    %279 = vector.broadcast %cst_105 : f32 to vector<2x128xf32>
    %280 = arith.addf %279, %278 : vector<2x128xf32>
    %281 = arith.divf %279, %280 : vector<2x128xf32>
    %282 = vector.extract_strided_slice %281 {offsets = [0, 0], sizes = [2, 32], strides = [1, 1]} : vector<2x128xf32> to vector<2x32xf32>
    %283 = vector.extract_strided_slice %281 {offsets = [0, 32], sizes = [2, 32], strides = [1, 1]} : vector<2x128xf32> to vector<2x32xf32>
    %284 = vector.extract_strided_slice %281 {offsets = [0, 96], sizes = [2, 32], strides = [1, 1]} : vector<2x128xf32> to vector<2x32xf32>
    %285 = vector.extract_strided_slice %276 {offsets = [0, 64], sizes = [2, 32], strides = [1, 1]} : vector<2x128xf32> to vector<2x32xf32>
    %286 = math.tanh %285 : vector<2x32xf32>
    %287 = arith.mulf %283, %265 : vector<2x32xf32>
    %288 = arith.mulf %282, %286 : vector<2x32xf32>
    %289 = arith.addf %287, %288 : vector<2x32xf32>
    %290 = math.tanh %289 : vector<2x32xf32>
    %291 = arith.mulf %284, %290 : vector<2x32xf32>
    %c0_106 = arith.constant 0 : index
    %292 = arith.index_cast %c2_i32_101 : i32 to index
    %c0_107 = arith.constant 0 : index
    %293 = vector.load %arg6[%c0_106, %292, %c0_107] : memref<2x8x32xf32, #tpu.memory_space<vmem>>, vector<2x1x32xf32>
    %294 = vector.shape_cast %293 : vector<2x1x32xf32> to vector<2x32xf32>
    %295 = vector.shape_cast %291 : vector<2x32xf32> to vector<2x1x32xf32>
    tpu.vector_store %arg6[%c0_106, %292, %c0_107], %295 {strides = array<i32>} : memref<2x8x32xf32, #tpu.memory_space<vmem>>, vector<2x1x32xf32>,
    %c3_i32_108 = arith.constant 3 : i32
    %c0_109 = arith.constant 0 : index
    %296 = arith.index_cast %c3_i32_108 : i32 to index
    %c0_110 = arith.constant 0 : index
    %297 = vector.load %arg7[%c0_109, %296, %c0_110] : memref<2x8x128xf32, #tpu.memory_space<vmem>>, vector<2x1x128xf32>
    %298 = vector.shape_cast %297 : vector<2x1x128xf32> to vector<2x128xf32>
    %cst_111 = arith.constant dense<0.000000e+00> : vector<2x128xf32>
    %299 = tpu.matmul %291, %212, %cst_111 {dimension_numbers = #tpu.dot_dimension_numbers<[1], [0], [0], [1], [0, 0, 1, 1], [], []>} : vector<2x32xf32>, vector<32x128xf32>, vector<2x128xf32> -> vector<2x128xf32>
    %300 = arith.addf %298, %299 : vector<2x128xf32>
    %301 = arith.negf %300 : vector<2x128xf32>
    %302 = math.exp %301 : vector<2x128xf32>
    %cst_112 = arith.constant 1.000000e+00 : f32
    %303 = vector.broadcast %cst_112 : f32 to vector<2x128xf32>
    %304 = arith.addf %303, %302 : vector<2x128xf32>
    %305 = arith.divf %303, %304 : vector<2x128xf32>
    %306 = vector.extract_strided_slice %305 {offsets = [0, 0], sizes = [2, 32], strides = [1, 1]} : vector<2x128xf32> to vector<2x32xf32>
    %307 = vector.extract_strided_slice %305 {offsets = [0, 32], sizes = [2, 32], strides = [1, 1]} : vector<2x128xf32> to vector<2x32xf32>
    %308 = vector.extract_strided_slice %305 {offsets = [0, 96], sizes = [2, 32], strides = [1, 1]} : vector<2x128xf32> to vector<2x32xf32>
    %309 = vector.extract_strided_slice %300 {offsets = [0, 64], sizes = [2, 32], strides = [1, 1]} : vector<2x128xf32> to vector<2x32xf32>
    %310 = math.tanh %309 : vector<2x32xf32>
    %311 = arith.mulf %307, %289 : vector<2x32xf32>
    %312 = arith.mulf %306, %310 : vector<2x32xf32>
    %313 = arith.addf %311, %312 : vector<2x32xf32>
    %314 = math.tanh %313 : vector<2x32xf32>
    %315 = arith.mulf %308, %314 : vector<2x32xf32>
    %c0_113 = arith.constant 0 : index
    %316 = arith.index_cast %c3_i32_108 : i32 to index
    %c0_114 = arith.constant 0 : index
    %317 = vector.load %arg6[%c0_113, %316, %c0_114] : memref<2x8x32xf32, #tpu.memory_space<vmem>>, vector<2x1x32xf32>
    %318 = vector.shape_cast %317 : vector<2x1x32xf32> to vector<2x32xf32>
    %319 = vector.shape_cast %315 : vector<2x32xf32> to vector<2x1x32xf32>
    tpu.vector_store %arg6[%c0_113, %316, %c0_114], %319 {strides = array<i32>} : memref<2x8x32xf32, #tpu.memory_space<vmem>>, vector<2x1x32xf32>,
    %c4_i32_115 = arith.constant 4 : i32
    %c0_116 = arith.constant 0 : index
    %320 = arith.index_cast %c4_i32_115 : i32 to index
    %c0_117 = arith.constant 0 : index
    %321 = vector.load %arg7[%c0_116, %320, %c0_117] : memref<2x8x128xf32, #tpu.memory_space<vmem>>, vector<2x1x128xf32>
    %322 = vector.shape_cast %321 : vector<2x1x128xf32> to vector<2x128xf32>
    %cst_118 = arith.constant dense<0.000000e+00> : vector<2x128xf32>
    %323 = tpu.matmul %315, %212, %cst_118 {dimension_numbers = #tpu.dot_dimension_numbers<[1], [0], [0], [1], [0, 0, 1, 1], [], []>} : vector<2x32xf32>, vector<32x128xf32>, vector<2x128xf32> -> vector<2x128xf32>
    %324 = arith.addf %322, %323 : vector<2x128xf32>
    %325 = arith.negf %324 : vector<2x128xf32>
    %326 = math.exp %325 : vector<2x128xf32>
    %cst_119 = arith.constant 1.000000e+00 : f32
    %327 = vector.broadcast %cst_119 : f32 to vector<2x128xf32>
    %328 = arith.addf %327, %326 : vector<2x128xf32>
    %329 = arith.divf %327, %328 : vector<2x128xf32>
    %330 = vector.extract_strided_slice %329 {offsets = [0, 0], sizes = [2, 32], strides = [1, 1]} : vector<2x128xf32> to vector<2x32xf32>
    %331 = vector.extract_strided_slice %329 {offsets = [0, 32], sizes = [2, 32], strides = [1, 1]} : vector<2x128xf32> to vector<2x32xf32>
    %332 = vector.extract_strided_slice %329 {offsets = [0, 96], sizes = [2, 32], strides = [1, 1]} : vector<2x128xf32> to vector<2x32xf32>
    %333 = vector.extract_strided_slice %324 {offsets = [0, 64], sizes = [2, 32], strides = [1, 1]} : vector<2x128xf32> to vector<2x32xf32>
    %334 = math.tanh %333 : vector<2x32xf32>
    %335 = arith.mulf %331, %313 : vector<2x32xf32>
    %336 = arith.mulf %330, %334 : vector<2x32xf32>
    %337 = arith.addf %335, %336 : vector<2x32xf32>
    %338 = math.tanh %337 : vector<2x32xf32>
    %339 = arith.mulf %332, %338 : vector<2x32xf32>
    %c0_120 = arith.constant 0 : index
    %340 = arith.index_cast %c4_i32_115 : i32 to index
    %c0_121 = arith.constant 0 : index
    %341 = vector.load %arg6[%c0_120, %340, %c0_121] : memref<2x8x32xf32, #tpu.memory_space<vmem>>, vector<2x1x32xf32>
    %342 = vector.shape_cast %341 : vector<2x1x32xf32> to vector<2x32xf32>
    %343 = vector.shape_cast %339 : vector<2x32xf32> to vector<2x1x32xf32>
    tpu.vector_store %arg6[%c0_120, %340, %c0_121], %343 {strides = array<i32>} : memref<2x8x32xf32, #tpu.memory_space<vmem>>, vector<2x1x32xf32>,
    %c5_i32_122 = arith.constant 5 : i32
    %c0_123 = arith.constant 0 : index
    %344 = arith.index_cast %c5_i32_122 : i32 to index
    %c0_124 = arith.constant 0 : index
    %345 = vector.load %arg7[%c0_123, %344, %c0_124] : memref<2x8x128xf32, #tpu.memory_space<vmem>>, vector<2x1x128xf32>
    %346 = vector.shape_cast %345 : vector<2x1x128xf32> to vector<2x128xf32>
    %cst_125 = arith.constant dense<0.000000e+00> : vector<2x128xf32>
    %347 = tpu.matmul %339, %212, %cst_125 {dimension_numbers = #tpu.dot_dimension_numbers<[1], [0], [0], [1], [0, 0, 1, 1], [], []>} : vector<2x32xf32>, vector<32x128xf32>, vector<2x128xf32> -> vector<2x128xf32>
    %348 = arith.addf %346, %347 : vector<2x128xf32>
    %349 = arith.negf %348 : vector<2x128xf32>
    %350 = math.exp %349 : vector<2x128xf32>
    %cst_126 = arith.constant 1.000000e+00 : f32
    %351 = vector.broadcast %cst_126 : f32 to vector<2x128xf32>
    %352 = arith.addf %351, %350 : vector<2x128xf32>
    %353 = arith.divf %351, %352 : vector<2x128xf32>
    %354 = vector.extract_strided_slice %353 {offsets = [0, 0], sizes = [2, 32], strides = [1, 1]} : vector<2x128xf32> to vector<2x32xf32>
    %355 = vector.extract_strided_slice %353 {offsets = [0, 32], sizes = [2, 32], strides = [1, 1]} : vector<2x128xf32> to vector<2x32xf32>
    %356 = vector.extract_strided_slice %353 {offsets = [0, 96], sizes = [2, 32], strides = [1, 1]} : vector<2x128xf32> to vector<2x32xf32>
    %357 = vector.extract_strided_slice %348 {offsets = [0, 64], sizes = [2, 32], strides = [1, 1]} : vector<2x128xf32> to vector<2x32xf32>
    %358 = math.tanh %357 : vector<2x32xf32>
    %359 = arith.mulf %355, %337 : vector<2x32xf32>
    %360 = arith.mulf %354, %358 : vector<2x32xf32>
    %361 = arith.addf %359, %360 : vector<2x32xf32>
    %362 = math.tanh %361 : vector<2x32xf32>
    %363 = arith.mulf %356, %362 : vector<2x32xf32>
    %c0_127 = arith.constant 0 : index
    %364 = arith.index_cast %c5_i32_122 : i32 to index
    %c0_128 = arith.constant 0 : index
    %365 = vector.load %arg6[%c0_127, %364, %c0_128] : memref<2x8x32xf32, #tpu.memory_space<vmem>>, vector<2x1x32xf32>
    %366 = vector.shape_cast %365 : vector<2x1x32xf32> to vector<2x32xf32>
    %367 = vector.shape_cast %363 : vector<2x32xf32> to vector<2x1x32xf32>
    tpu.vector_store %arg6[%c0_127, %364, %c0_128], %367 {strides = array<i32>} : memref<2x8x32xf32, #tpu.memory_space<vmem>>, vector<2x1x32xf32>,
    %c6_i32_129 = arith.constant 6 : i32
    %c0_130 = arith.constant 0 : index
    %368 = arith.index_cast %c6_i32_129 : i32 to index
    %c0_131 = arith.constant 0 : index
    %369 = vector.load %arg7[%c0_130, %368, %c0_131] : memref<2x8x128xf32, #tpu.memory_space<vmem>>, vector<2x1x128xf32>
    %370 = vector.shape_cast %369 : vector<2x1x128xf32> to vector<2x128xf32>
    %cst_132 = arith.constant dense<0.000000e+00> : vector<2x128xf32>
    %371 = tpu.matmul %363, %212, %cst_132 {dimension_numbers = #tpu.dot_dimension_numbers<[1], [0], [0], [1], [0, 0, 1, 1], [], []>} : vector<2x32xf32>, vector<32x128xf32>, vector<2x128xf32> -> vector<2x128xf32>
    %372 = arith.addf %370, %371 : vector<2x128xf32>
    %373 = arith.negf %372 : vector<2x128xf32>
    %374 = math.exp %373 : vector<2x128xf32>
    %cst_133 = arith.constant 1.000000e+00 : f32
    %375 = vector.broadcast %cst_133 : f32 to vector<2x128xf32>
    %376 = arith.addf %375, %374 : vector<2x128xf32>
    %377 = arith.divf %375, %376 : vector<2x128xf32>
    %378 = vector.extract_strided_slice %377 {offsets = [0, 0], sizes = [2, 32], strides = [1, 1]} : vector<2x128xf32> to vector<2x32xf32>
    %379 = vector.extract_strided_slice %377 {offsets = [0, 32], sizes = [2, 32], strides = [1, 1]} : vector<2x128xf32> to vector<2x32xf32>
    %380 = vector.extract_strided_slice %377 {offsets = [0, 96], sizes = [2, 32], strides = [1, 1]} : vector<2x128xf32> to vector<2x32xf32>
    %381 = vector.extract_strided_slice %372 {offsets = [0, 64], sizes = [2, 32], strides = [1, 1]} : vector<2x128xf32> to vector<2x32xf32>
    %382 = math.tanh %381 : vector<2x32xf32>
    %383 = arith.mulf %379, %361 : vector<2x32xf32>
    %384 = arith.mulf %378, %382 : vector<2x32xf32>
    %385 = arith.addf %383, %384 : vector<2x32xf32>
    %386 = math.tanh %385 : vector<2x32xf32>
    %387 = arith.mulf %380, %386 : vector<2x32xf32>
    %c0_134 = arith.constant 0 : index
    %388 = arith.index_cast %c6_i32_129 : i32 to index
    %c0_135 = arith.constant 0 : index
    %389 = vector.load %arg6[%c0_134, %388, %c0_135] : memref<2x8x32xf32, #tpu.memory_space<vmem>>, vector<2x1x32xf32>
    %390 = vector.shape_cast %389 : vector<2x1x32xf32> to vector<2x32xf32>
    %391 = vector.shape_cast %387 : vector<2x32xf32> to vector<2x1x32xf32>
    tpu.vector_store %arg6[%c0_134, %388, %c0_135], %391 {strides = array<i32>} : memref<2x8x32xf32, #tpu.memory_space<vmem>>, vector<2x1x32xf32>,
    %c7_i32_136 = arith.constant 7 : i32
    %c0_137 = arith.constant 0 : index
    %392 = arith.index_cast %c7_i32_136 : i32 to index
    %c0_138 = arith.constant 0 : index
    %393 = vector.load %arg7[%c0_137, %392, %c0_138] : memref<2x8x128xf32, #tpu.memory_space<vmem>>, vector<2x1x128xf32>
    %394 = vector.shape_cast %393 : vector<2x1x128xf32> to vector<2x128xf32>
    %cst_139 = arith.constant dense<0.000000e+00> : vector<2x128xf32>
    %395 = tpu.matmul %387, %212, %cst_139 {dimension_numbers = #tpu.dot_dimension_numbers<[1], [0], [0], [1], [0, 0, 1, 1], [], []>} : vector<2x32xf32>, vector<32x128xf32>, vector<2x128xf32> -> vector<2x128xf32>
    %396 = arith.addf %394, %395 : vector<2x128xf32>
    %397 = arith.negf %396 : vector<2x128xf32>
    %398 = math.exp %397 : vector<2x128xf32>
    %cst_140 = arith.constant 1.000000e+00 : f32
    %399 = vector.broadcast %cst_140 : f32 to vector<2x128xf32>
    %400 = arith.addf %399, %398 : vector<2x128xf32>
    %401 = arith.divf %399, %400 : vector<2x128xf32>
    %402 = vector.extract_strided_slice %401 {offsets = [0, 0], sizes = [2, 32], strides = [1, 1]} : vector<2x128xf32> to vector<2x32xf32>
    %403 = vector.extract_strided_slice %401 {offsets = [0, 32], sizes = [2, 32], strides = [1, 1]} : vector<2x128xf32> to vector<2x32xf32>
    %404 = vector.extract_strided_slice %401 {offsets = [0, 96], sizes = [2, 32], strides = [1, 1]} : vector<2x128xf32> to vector<2x32xf32>
    %405 = vector.extract_strided_slice %396 {offsets = [0, 64], sizes = [2, 32], strides = [1, 1]} : vector<2x128xf32> to vector<2x32xf32>
    %406 = math.tanh %405 : vector<2x32xf32>
    %407 = arith.mulf %403, %385 : vector<2x32xf32>
    %408 = arith.mulf %402, %406 : vector<2x32xf32>
    %409 = arith.addf %407, %408 : vector<2x32xf32>
    %410 = math.tanh %409 : vector<2x32xf32>
    %411 = arith.mulf %404, %410 : vector<2x32xf32>
    %c0_141 = arith.constant 0 : index
    %412 = arith.index_cast %c7_i32_136 : i32 to index
    %c0_142 = arith.constant 0 : index
    %413 = vector.load %arg6[%c0_141, %412, %c0_142] : memref<2x8x32xf32, #tpu.memory_space<vmem>>, vector<2x1x32xf32>
    %414 = vector.shape_cast %413 : vector<2x1x32xf32> to vector<2x32xf32>
    %415 = vector.shape_cast %411 : vector<2x32xf32> to vector<2x1x32xf32>
    tpu.vector_store %arg6[%c0_141, %412, %c0_142], %415 {strides = array<i32>} : memref<2x8x32xf32, #tpu.memory_space<vmem>>, vector<2x1x32xf32>,
    %c8_i32_143 = arith.constant 8 : i32
    %c0_144 = arith.constant 0 : index
    %c0_145 = arith.constant 0 : index
    %416 = vector.load %arg5[%c0_144, %c0_145] : memref<2x32xf32, #tpu.memory_space<vmem>>, vector<2x32xf32>
    tpu.vector_store %arg5[%c0_144, %c0_145], %411 {strides = array<i32>} : memref<2x32xf32, #tpu.memory_space<vmem>>, vector<2x32xf32>,
    return
  }
  func.func @transform_0(%arg0: i32) -> (i32, i32, i32) {
    %c0_i32 = arith.constant 0 : i32
    %c0_i32_0 = arith.constant 0 : i32
    %c0_i32_1 = arith.constant 0 : i32
    return %arg0, %c0_i32, %c0_i32_0 : i32, i32, i32
  }
  func.func @transform_1(%arg0: i32) -> (i32, i32, i32) {
    %c0_i32 = arith.constant 0 : i32
    %c0_i32_0 = arith.constant 0 : i32
    %c0_i32_1 = arith.constant 0 : i32
    %c0_i32_2 = arith.constant 0 : i32
    return %c0_i32, %c0_i32_0, %c0_i32_1 : i32, i32, i32
  }
  func.func @transform_2(%arg0: i32) -> (i32, i32, i32) {
    %c0_i32 = arith.constant 0 : i32
    %c0_i32_0 = arith.constant 0 : i32
    %c0_i32_1 = arith.constant 0 : i32
    %c0_i32_2 = arith.constant 0 : i32
    return %c0_i32, %c0_i32_0, %c0_i32_1 : i32, i32, i32
  }
  func.func @transform_3(%arg0: i32) -> (i32, i32, i32) {
    %c0_i32 = arith.constant 0 : i32
    %c0_i32_0 = arith.constant 0 : i32
    %c0_i32_1 = arith.constant 0 : i32
    %c0_i32_2 = arith.constant 0 : i32
    return %c0_i32, %c0_i32_0, %c0_i32_1 : i32, i32, i32
  }
  func.func @transform_4(%arg0: i32) -> (i32, i32) {
    %c0_i32 = arith.constant 0 : i32
    %c0_i32_0 = arith.constant 0 : i32
    return %arg0, %c0_i32 : i32, i32
  }
}

</mosaic_0001>

<bundles_post_ra>
// kernel: tpu_custom_call.1
= control target key start
LH: loop header
LB: loop body
LE: loop exit
PB: predicated region body
PF: predicated region fallthrough
CT: control target
= control target key end

     0   :  { %9 = vsyncpa [#allocation5], 0  ;;  %s3893_s0 = inlined_call_operand.hbm [shape: f32[2,8,32], index: 0, kind: input, shape index: {}]   ;;  %s3894_s1 = inlined_call_operand.hbm [shape: f32[2,32,128], index: 1, kind: input, shape index: {}]   ;;  %s3895_s2 = inlined_call_operand.hbm [shape: f32[2,32,128], index: 2, kind: input, shape index: {}]   ;;  %s3896_s3 = inlined_call_operand.vmem [shape: f32[2,1,128], index: 3, kind: input, shape index: {}]   ;;  %s3897_s4 = inlined_call_operand.hbm [shape: f32[2,32], index: 4, kind: output, shape index: {}]  }
   0x1   :  { %10 = vsyncpa [#allocation8], 0 }
   0x2   :  { %11 = vsyncpa [#allocation6], 0  ;;  %s3371_s15 = smov [#allocation7]   ;;  %s3372_s17 = smov [#allocation4]  }
   0x3   :  { %s29_s16 = sshll.u32 %s3371_s15, 4  ;;  %s17_s18 = sshll.u32 %s3372_s17, 4  ;;  %s30_s16 = int_to_ptr.vmem [resolvable:$true] %s29_s16  ;;  %s3407_s18 = int_to_ptr.vmem [resolvable:$true] %s17_s18 }
   0x4   :  { %s3277_s21 = scalar_lea.hbm %s3894_s1, 1024 }
   0x5   :  { %p3278_p0 = scmp.ne.s32.totalorder %s3894_s1, %s3277_s21  ;;  %p3281_p1 = scmp.lt.u32.totalorder %s3277_s21, %s3894_s1 }
   0x7   :  { %p3283_p2 = pnand %p3281_p1, %p3278_p0 }
   0x9   :  { %3286 = shalt.err (!%p3283_p2)
}
   0xa   :  { %s3287_s26 = scalar_lea.vmem %s30_s16, 1024  ;;  %p3292_p4 = scmp.lt.s32.totalorder %s30_s16, %s30_s16 }
   0xb   :  { %p3288_p3 = scmp.ne.s32.totalorder %s30_s16, %s3287_s26  ;;  %p3293_p5 = scmp.lt.s32.totalorder %s3287_s26, %s3287_s26 }
   0xd   :  { %p3294_p6 = por %p3293_p5, %p3292_p4 }
   0xf   :  { %p3295_p7 = pnand %p3294_p6, %p3288_p3 }
  0x11   :  { %3298 = shalt.err (!%p3295_p7)
}
  0x12   :  { %s3373_s27 = smov 128   ;;  %s3374_s28 = smov 8  }
  0x13   :  { %35 = dma.hbm_to_vmem [thread:$0]  %s3894_s1, 1024, %s30_s16, [#allocation8], %s3373_s27, %s3373_s27, %s3374_s28  }
  0x14   :  { %s3299_s7 = scalar_lea.hbm %s3893_s0, 256 }
  0x15   :  { %p3300_p8 = scmp.ne.s32.totalorder %s3893_s0, %s3299_s7  ;;  %p3303_p9 = scmp.lt.u32.totalorder %s3299_s7, %s3893_s0 }
  0x17   :  { %p3305_p10 = pnand %p3303_p9, %p3300_p8 }
  0x19   :  { %3308 = shalt.err (!%p3305_p10)
}
  0x1a   :  { %s3309_s12 = scalar_lea.vmem %s3407_s18, 256  ;;  %p3314_p12 = scmp.lt.s32.totalorder %s3407_s18, %s3407_s18 }
  0x1b   :  { %p3310_p11 = scmp.ne.s32.totalorder %s3407_s18, %s3309_s12  ;;  %p3315_p13 = scmp.lt.s32.totalorder %s3309_s12, %s3309_s12 }
  0x1d   :  { %p3316_p0 = por %p3315_p13, %p3314_p12 }
  0x1f   :  { %p3317_p1 = pnand %p3316_p0, %p3310_p11 }
  0x21   :  { %3320 = shalt.err (!%p3317_p1)
}
  0x22   :  { %23 = dma.hbm_to_vmem [thread:$0]  %s3893_s0, 256, %s3407_s18, [#allocation5], %s3373_s27, %s3373_s27, %s3374_s28  }
  0x23   :  { %s3375_s14 = smov [#allocation9]   ;;  %s3321_s19 = scalar_lea.hbm %s3895_s2, 1024 }
  0x24   :  { %s41_s15 = sshll.u32 %s3375_s14, 4  ;;  %p3322_p2 = scmp.ne.s32.totalorder %s3895_s2, %s3321_s19  ;;  %s42_s15 = int_to_ptr.vmem [resolvable:$true] %s41_s15 }
  0x25   :  { %p3325_p3 = scmp.lt.u32.totalorder %s3321_s19, %s3895_s2 }
  0x27   :  { %p3327_p4 = pnand %p3325_p3, %p3322_p2 }
  0x29   :  { %3330 = shalt.err (!%p3327_p4)
}
  0x2a   :  { %s3331_s24 = scalar_lea.vmem %s42_s15, 1024  ;;  %p3336_p6 = scmp.lt.s32.totalorder %s42_s15, %s42_s15 }
  0x2b   :  { %p3332_p5 = scmp.ne.s32.totalorder %s42_s15, %s3331_s24  ;;  %p3337_p7 = scmp.lt.s32.totalorder %s3331_s24, %s3331_s24 }
  0x2d   :  { %p3338_p8 = por %p3337_p7, %p3336_p6 }
  0x2f   :  { %p3339_p9 = pnand %p3338_p8, %p3332_p5 }
  0x31   :  { %3342 = shalt.err (!%p3339_p9)
}
  0x32   :  { %47 = dma.hbm_to_vmem [thread:$0]  %s3895_s2, 1024, %s42_s15, [#allocation8], %s3373_s27, %s3373_s27, %s3374_s28  }
  0x33   :  { %3365 = dma.done.wait [#allocation5], 256  }
  0x34   :  { %3366 = vsyncadd [#allocation5], 4294967040 }
  0x35   :  { %3367 = dma.done.wait [#allocation8], 2048  }
  0x36   :  { %3368 = vsyncadd [#allocation8], 4294965248  ;;  %v3376_v0 = vmov 0.0|0.0   ;;  %vm3377_vm0 = vmmov 0   ;;  %v3378_v1 = vmov 0.0   ;;  %vm61_vm1 = vcmask 261120  }
  0x37   :  { %2906 = vmatprep.subr.bf16.mxu1 %v3376_v0  ;;  %2719 = vmatprep.mubr.msk.f32.mxu1 %vm3377_vm0, %v3378_v1  ;;  %v64_v2 = vld [vmem:[#allocation7] sm:$0xff]  ;;  %v65_v3 = vld [vmem:[#allocation7 + $0x8] sm:$0xff]  ;;  %v66_v4 = vld [vmem:[#allocation7 + $0x10] sm:$0xff]  ;;  %s3379_s26 = smov 64   ;;  %s3380_s27 = smov 32   ;;  %vm307_vm2 = vcmask 1041409  }
  0x38   :  { %v2898_v5 = vpack.c.bf16 %v65_v3, %v64_v2  ;;  %v67_v6 = vld [vmem:[#allocation7 + $0x18] sm:$0xff]  ;;  %v59_v7 = vld [vmem:[#allocation4] sm:$0xff]  ;;  %v68_v10 = vld [vmem:[#allocation9] sm:$0xff]  ;;  %vm301_vm3 = vcmask 253952   ;;  %vm2537_vm4 = vcmask 254976  }
  0x39   :  { %v60_v8 = vld [vmem:[#allocation4 + $0x8] sm:$0xff]  ;;  %v2902_v9 = vpack.c.bf16 %v67_v6, %v66_v4  ;;  %62 = vst.msk [vmem:[#allocation2] sm:$0xff] %vm61_vm1, %v59_v7  ;;  %v69_v11 = vld [vmem:[#allocation9 + $0x8] sm:$0xff]  ;;  %v70_v12 = vld [vmem:[#allocation9 + $0x10] sm:$0xff] }
  0x3a   :  { %63 = vst.msk [vmem:[#allocation2 + $0x8] sm:$0xff] %vm61_vm1, %v60_v8  ;;  %2899 = vmatprep.subr.bf16.mxu0 %v2898_v5  ;;  %v3464_v13 = vpack.c.bf16 %v69_v11, %v68_v10  ;;  %v71_v14 = vld [vmem:[#allocation9 + $0x18] sm:$0xff]  ;;  %v2555_v18 = vld [vmem:[%s3896_s3] ss:$0 sm:$0xff] }
  0x3b   :  { %2901 = vmatpush3.bf16.msra.mxu0 %v2898_v5  ;;  %v3467_v15 = vpack.c.bf16 %v71_v14, %v70_v12 }
  0x3c   :  { %2903 = vmatprep.subr.bf16.mxu0 %v2902_v9  ;;  %2908 = vmatpush3.bf16.msra.mxu1 %v3464_v13 }
  0x3d   :  { %2909 = vmatprep.subr.bf16.mxu1 %v3376_v0 }
  0x3f   :  { %2905 = vmatpush3.bf16.msra.mxu0 %v2902_v9 }
  0x40   :  { %v73_v16 = vld [vmem:[#allocation2] sm:$0xff]  ;;  %2911 = vmatpush3.bf16.msra.mxu1 %v3467_v15  ;;  %2912 = vmatprep.subr.bf16.mxu0 %v3376_v0 }
  0x41   :  { %v74_v17 = vld [vmem:[#allocation2 + $0x8] sm:$0xff]  ;;  %2708 = vmatprep.mubr.msk.f32.mxu0 %vm61_vm1, %v73_v16  ;;  %2918 = vmatprep.subr.bf16.mxu1 %v3376_v0 }
  0x42   :  { %2709 = vmatmul.mubr.msk.f32.vlgmr.msra.gmra.mrb[0].mxu0 %vm61_vm1, %v74_v17 }
  0x43   :  { %2720 = vmatmul.mubr.f32.vlgmr.msra.gmra.mrb[0].mxu1 %v3378_v1  ;;  %2914 = vmatpush3.bf16.msra.mxu0 %v3464_v13 }
  0x44   :  { %2915 = vmatprep.subr.bf16.mxu0 %v3376_v0  ;;  %2730 = vmatprep.mubr.msk.f32.mxu0 %vm3377_vm0, %v3378_v1 }
  0x45   :  { %2920 = vmatpush3.bf16.msra.mxu1 %v3464_v13  ;;  %2741 = vmatprep.mubr.msk.f32.mxu1 %vm3377_vm0, %v3378_v1 }
  0x46   :  { %2921 = vmatprep.subr.bf16.mxu1 %v3376_v0 }
  0x47   :  { %2917 = vmatpush3.bf16.msra.mxu0 %v3467_v15 }
  0x48   :  { %2924 = vmatprep.subr.bf16.mxu0 %v3376_v0 }
  0x49   :  { %2923 = vmatpush3.bf16.msra.mxu1 %v3467_v15 }
  0x4a   :  { %2930 = vmatprep.subr.bf16.mxu1 %v3376_v0 }
 0x115   :  { %v2710_v19 = vpop.f32.mrb[0].mxu0 }
 0x116   :  { %v159_v20 = vadd.f32 %v2710_v19, %v2555_v18  ;;  %v153_v21 = vpop.f32.mrb[1].mxu0  ;;  %v235_v22 = vpop.f32.mrb[0].mxu1 }
 0x117   :  { %v154_v23 = vadd.f32 %v2555_v18, %v153_v21  ;;  %v2721_v24 = vpop.f32.mrb[1].mxu1  ;;  %v240_v25 = vrot.slane %v235_v22, 1 }
 0x118   :  { %163 = vst [vmem:[#allocation3 + $0x8] sm:$0xff] %v159_v20 }
 0x119   :  { %162 = vst [vmem:[#allocation3] sm:$0xff] %v154_v23 }
 0x11f   :  { %v165_v26 = vld [vmem:[#allocation3 + $0x8] sm:$0x1]  ;;  %v305_v2 = vld [vmem:[#allocation3 + $0x9] sm:$0x1] }
 0x120   :  { %v164_v27 = vld [vmem:[#allocation3] sm:$0x1]  ;;  %v244_v28 = vadd.f32 %v240_v25, %v165_v26  ;;  %v304_v59 = vld [vmem:[#allocation3 + $0x1] sm:$0x1] }
 0x121   :  { %v243_v29 = vadd.f32 %v235_v22, %v164_v27 }
 0x122   :  { %3021 = vtanh.f32 %v244_v28  ;;  %v2559_v32 = vmul.f32 -1.442695, %v244_v28 }
 0x123   :  { %3023 = vtanh.f32 %v243_v29  ;;  %v2558_v33 = vmul.f32 -1.442695, %v243_v29 }
 0x124   :  { %3025 = vpow2.f32 %v2559_v32 }
 0x125   :  { %3027 = vpow2.f32 %v2558_v33 }
 0x12c   :  { %v3022_v30 = vpop.eup %3021 }
 0x12d   :  { %265 = vrot.lane.b32.xlu0 %v3022_v30, %s3379_s26  ;;  %v3024_v31 = vpop.eup %3023 }
 0x12e   :  { %v3026_v34 = vpop.eup %3025 }
 0x12f   :  { %v252_v35 = vadd.f32 1.0, %v3026_v34  ;;  %v3028_v36 = vpop.eup %3027 }
 0x130   :  { %v251_v37 = vadd.f32 1.0, %v3028_v36 }
 0x131   :  { %263 = vrot.lane.b32.xlu0 %v3024_v31, %s3379_s26  ;;  %3029 = vrcp.f32 %v252_v35  ;;  %v447_v35 = vld [vmem:[#allocation3 + $0x2] sm:$0x1] }
 0x132   :  { %3031 = vrcp.f32 %v251_v37 }
 0x13b   :  { %v3030_v38 = vpop.eup %3029 }
 0x13c   :  { %v3032_v41 = vpop.eup %3031  ;;  %v260_v44 = vmul.f32 0.0, %v3030_v38 }
 0x13d   :  { %v259_v47 = vmul.f32 0.0, %v3032_v41 }
 0x19f   :  { %v266_v39 = vpop.permute.xlu0 %265 }
 0x1a0   :  { %v270_v40 = vmul.f32 %v3030_v38, %v266_v39 }
 0x1a2   :  { %275 = vrot.lane.b32.xlu1 %v270_v40, %s3380_s27  ;;  %v448_v40 = vld [vmem:[#allocation3 + $0xa] sm:$0x1] }
 0x1a3   :  { %v264_v42 = vpop.permute.xlu0 %263 }
 0x1a4   :  { %v269_v43 = vmul.f32 %v3032_v41, %v264_v42 }
 0x1a6   :  { %273 = vrot.lane.b32.xlu1 %v269_v43, %s3380_s27 }
 0x214   :  { %v276_v45 = vpop.permute.xlu1 %275 }
 0x215   :  { %v280_v46 = vadd.f32 %v276_v45, %v260_v44 }
 0x217   :  { %3033 = vtanh.f32 %v280_v46 }
 0x218   :  { %v274_v48 = vpop.permute.xlu1 %273 }
 0x219   :  { %v279_v49 = vadd.f32 %v274_v48, %v259_v47 }
 0x21b   :  { %3035 = vtanh.f32 %v279_v49 }
 0x221   :  { %v3034_v50 = vpop.eup %3033 }
 0x222   :  { %287 = vrot.lane.b32.xlu0 %v3034_v50, %s3379_s26 }
 0x225   :  { %v3036_v51 = vpop.eup %3035 }
 0x226   :  { %285 = vrot.lane.b32.xlu1 %v3036_v51, %s3379_s26 }
 0x294   :  { %v288_v52 = vpop.permute.xlu0 %287 }
 0x295   :  { %v3497_v53 = vmul.f32 %v3030_v38, %v288_v52 }
 0x297   :  { %v306_v55 = vrot.slane %v3497_v53, 7 }
 0x298   :  { %v286_v54 = vpop.permute.xlu1 %285 }
 0x299   :  { %v3500_v56 = vmul.f32 %v3032_v41, %v286_v54 }
 0x29b   :  { %v308_v57 = vsel %vm307_vm2, %v306_v55, %v3500_v56 }
 0x29c   :  { %309 = vrot.lane.b32.xlu0 %v308_v57, %s3380_s27 }
 0x30e   :  { %v310_v58 = vpop.permute.xlu0 %309 }
 0x30f   :  { %2731 = vmatmul.mubr.msk.f32.vlgmr.msra.gmra.mrb[2].mxu0 %vm61_vm1, %v310_v58 }
 0x310   :  { %2926 = vmatpush3.bf16.msra.mxu0 %v3464_v13  ;;  %2752 = vmatprep.mubr.msk.f32.mxu0 %vm3377_vm0, %v3378_v1 }
 0x311   :  { %2927 = vmatprep.subr.bf16.mxu0 %v3376_v0 }
 0x314   :  { %2929 = vmatpush3.bf16.msra.mxu0 %v3467_v15 }
 0x315   :  { %2936 = vmatprep.subr.bf16.mxu0 %v3376_v0 }
 0x3e2   :  { %v379_v60 = vpop.f32.mrb[2].mxu0 }
 0x3e3   :  { %v384_v61 = vrot.slane %v379_v60, 1  ;;  %v387_v62 = vadd.f32 %v379_v60, %v304_v59  ;;  %v2732_v63 = vpop.f32.mrb[3].mxu0 }
 0x3e5   :  { %v388_v3 = vadd.f32 %v384_v61, %v305_v2  ;;  %3037 = vtanh.f32 %v387_v62  ;;  %v2561_v6 = vmul.f32 -1.442695, %v387_v62 }
 0x3e7   :  { %3039 = vtanh.f32 %v388_v3  ;;  %v2562_v7 = vmul.f32 -1.442695, %v388_v3 }
 0x3e8   :  { %3041 = vpow2.f32 %v2561_v6 }
 0x3e9   :  { %3043 = vpow2.f32 %v2562_v7 }
 0x3ef   :  { %v3038_v4 = vpop.eup %3037 }
 0x3f0   :  { %407 = vrot.lane.b32.xlu0 %v3038_v4, %s3379_s26 }
 0x3f1   :  { %v3040_v5 = vpop.eup %3039 }
 0x3f2   :  { %409 = vrot.lane.b32.xlu1 %v3040_v5, %s3379_s26  ;;  %v3042_v8 = vpop.eup %3041 }
 0x3f3   :  { %v3044_v9 = vpop.eup %3043  ;;  %v395_v10 = vadd.f32 1.0, %v3042_v8 }
 0x3f4   :  { %v396_v11 = vadd.f32 1.0, %v3044_v9 }
 0x3f5   :  { %3045 = vrcp.f32 %v395_v10 }
 0x3f6   :  { %3047 = vrcp.f32 %v396_v11  ;;  %v589_v11 = vld [vmem:[#allocation3 + $0x3] sm:$0x1] }
 0x3ff   :  { %v3046_v12 = vpop.eup %3045 }
 0x400   :  { %v3048_v17 = vpop.eup %3047  ;;  %v403_v20 = vmul.f32 %v3046_v12, %v279_v49 }
 0x401   :  { %v404_v23 = vmul.f32 %v3048_v17, %v280_v46 }
 0x462   :  { %v408_v14 = vpop.permute.xlu0 %407 }
 0x463   :  { %v413_v16 = vmul.f32 %v3046_v12, %v408_v14 }
 0x464   :  { %v410_v18 = vpop.permute.xlu1 %409 }
 0x465   :  { %417 = vrot.lane.b32.xlu0 %v413_v16, %s3380_s27  ;;  %v414_v19 = vmul.f32 %v3048_v17, %v410_v18  ;;  %v590_v18 = vld [vmem:[#allocation3 + $0xb] sm:$0x1] }
 0x467   :  { %419 = vrot.lane.b32.xlu1 %v414_v19, %s3380_s27 }
 0x4d7   :  { %v418_v21 = vpop.permute.xlu0 %417 }
 0x4d8   :  { %v423_v22 = vadd.f32 %v418_v21, %v403_v20 }
 0x4d9   :  { %v420_v24 = vpop.permute.xlu1 %419 }
 0x4da   :  { %3049 = vtanh.f32 %v423_v22  ;;  %v424_v25 = vadd.f32 %v420_v24, %v404_v23 }
 0x4dc   :  { %3051 = vtanh.f32 %v424_v25 }
 0x4e4   :  { %v3050_v26 = vpop.eup %3049 }
 0x4e5   :  { %429 = vrot.lane.b32.xlu0 %v3050_v26, %s3379_s26 }
 0x4e6   :  { %v3052_v27 = vpop.eup %3051 }
 0x4e7   :  { %431 = vrot.lane.b32.xlu1 %v3052_v27, %s3379_s26 }
 0x557   :  { %v430_v28 = vpop.permute.xlu0 %429 }
 0x558   :  { %v3520_v31 = vmul.f32 %v3046_v12, %v430_v28 }
 0x559   :  { %v432_v29 = vpop.permute.xlu1 %431 }
 0x55a   :  { %v3518_v30 = vmul.f32 %v3048_v17, %v432_v29 }
 0x55c   :  { %v449_v32 = vrot.slane %v3518_v30, 7 }
 0x55e   :  { %v450_v33 = vsel %vm307_vm2, %v449_v32, %v3520_v31 }
 0x55f   :  { %451 = vrot.lane.b32.xlu1 %v450_v33, %s3380_s27 }
 0x5d1   :  { %v452_v34 = vpop.permute.xlu1 %451 }
 0x5d2   :  { %2742 = vmatmul.mubr.msk.f32.vlgmr.msra.gmra.mrb[2].mxu1 %vm61_vm1, %v452_v34 }
 0x5d3   :  { %2932 = vmatpush3.bf16.msra.mxu1 %v3464_v13  ;;  %2763 = vmatprep.mubr.msk.f32.mxu1 %vm3377_vm0, %v3378_v1 }
 0x5d4   :  { %2933 = vmatprep.subr.bf16.mxu1 %v3376_v0 }
 0x5d7   :  { %2935 = vmatpush3.bf16.msra.mxu1 %v3467_v15 }
 0x5d8   :  { %2942 = vmatprep.subr.bf16.mxu1 %v3376_v0 }
 0x6a5   :  { %v521_v36 = vpop.f32.mrb[2].mxu1 }
 0x6a6   :  { %v526_v37 = vrot.slane %v521_v36, 1  ;;  %v529_v38 = vadd.f32 %v521_v36, %v447_v35  ;;  %v2743_v39 = vpop.f32.mrb[3].mxu1 }
 0x6a8   :  { %v530_v41 = vadd.f32 %v526_v37, %v448_v40  ;;  %3053 = vtanh.f32 %v529_v38  ;;  %v2564_v44 = vmul.f32 -1.442695, %v529_v38 }
 0x6aa   :  { %3055 = vtanh.f32 %v530_v41  ;;  %v2565_v45 = vmul.f32 -1.442695, %v530_v41 }
 0x6ab   :  { %3057 = vpow2.f32 %v2564_v44 }
 0x6ac   :  { %3059 = vpow2.f32 %v2565_v45 }
 0x6b2   :  { %v3054_v42 = vpop.eup %3053 }
 0x6b3   :  { %549 = vrot.lane.b32.xlu1 %v3054_v42, %s3379_s26 }
 0x6b4   :  { %v3056_v43 = vpop.eup %3055 }
 0x6b5   :  { %551 = vrot.lane.b32.xlu0 %v3056_v43, %s3379_s26  ;;  %v3058_v46 = vpop.eup %3057 }
 0x6b6   :  { %v3060_v47 = vpop.eup %3059  ;;  %v537_v48 = vadd.f32 1.0, %v3058_v46 }
 0x6b7   :  { %v538_v49 = vadd.f32 1.0, %v3060_v47 }
 0x6b8   :  { %3061 = vrcp.f32 %v537_v48 }
 0x6b9   :  { %3063 = vrcp.f32 %v538_v49 }
 0x6c2   :  { %v3062_v50 = vpop.eup %3061 }
 0x6c3   :  { %v3064_v54 = vpop.eup %3063  ;;  %v545_v58 = vmul.f32 %v3062_v50, %v423_v22 }
 0x6c4   :  { %v546_v61 = vmul.f32 %v3064_v54, %v424_v25 }
 0x725   :  { %v550_v51 = vpop.permute.xlu1 %549 }
 0x726   :  { %v555_v52 = vmul.f32 %v3062_v50, %v550_v51  ;;  %v731_v51 = vld [vmem:[#allocation3 + $0x4] sm:$0x1] }
 0x727   :  { %v552_v55 = vpop.permute.xlu0 %551 }
 0x728   :  { %559 = vrot.lane.b32.xlu1 %v555_v52, %s3380_s27  ;;  %v556_v57 = vmul.f32 %v3064_v54, %v552_v55 }
 0x72a   :  { %561 = vrot.lane.b32.xlu0 %v556_v57, %s3380_s27 }
 0x79a   :  { %v560_v59 = vpop.permute.xlu1 %559 }
 0x79b   :  { %v565_v60 = vadd.f32 %v560_v59, %v545_v58  ;;  %v732_v58 = vld [vmem:[#allocation3 + $0xc] sm:$0x1] }
 0x79c   :  { %v562_v62 = vpop.permute.xlu0 %561 }
 0x79d   :  { %3065 = vtanh.f32 %v565_v60  ;;  %v566_v63 = vadd.f32 %v562_v62, %v546_v61 }
 0x79f   :  { %3067 = vtanh.f32 %v566_v63 }
 0x7a7   :  { %v3066_v2 = vpop.eup %3065 }
 0x7a8   :  { %571 = vrot.lane.b32.xlu1 %v3066_v2, %s3379_s26 }
 0x7a9   :  { %v3068_v3 = vpop.eup %3067 }
 0x7aa   :  { %573 = vrot.lane.b32.xlu0 %v3068_v3, %s3379_s26 }
 0x81a   :  { %v572_v4 = vpop.permute.xlu1 %571 }
 0x81b   :  { %v3541_v7 = vmul.f32 %v3062_v50, %v572_v4 }
 0x81c   :  { %v574_v5 = vpop.permute.xlu0 %573 }
 0x81d   :  { %v3539_v6 = vmul.f32 %v3064_v54, %v574_v5 }
 0x81f   :  { %v591_v8 = vrot.slane %v3539_v6, 7 }
 0x821   :  { %v592_v9 = vsel %vm307_vm2, %v591_v8, %v3541_v7 }
 0x822   :  { %593 = vrot.lane.b32.xlu0 %v592_v9, %s3380_s27 }
 0x894   :  { %v594_v10 = vpop.permute.xlu0 %593 }
 0x895   :  { %2753 = vmatmul.mubr.msk.f32.vlgmr.msra.gmra.mrb[4].mxu0 %vm61_vm1, %v594_v10 }
 0x896   :  { %2938 = vmatpush3.bf16.msra.mxu0 %v3464_v13  ;;  %2774 = vmatprep.mubr.msk.f32.mxu0 %vm3377_vm0, %v3378_v1 }
 0x897   :  { %2939 = vmatprep.subr.bf16.mxu0 %v3376_v0 }
 0x89a   :  { %2941 = vmatpush3.bf16.msra.mxu0 %v3467_v15 }
 0x89b   :  { %2948 = vmatprep.subr.bf16.mxu0 %v3376_v0 }
 0x968   :  { %v663_v12 = vpop.f32.mrb[4].mxu0 }
 0x969   :  { %v668_v14 = vrot.slane %v663_v12, 1  ;;  %v671_v16 = vadd.f32 %v663_v12, %v589_v11  ;;  %v2754_v17 = vpop.f32.mrb[5].mxu0 }
 0x96b   :  { %v672_v19 = vadd.f32 %v668_v14, %v590_v18  ;;  %3069 = vtanh.f32 %v671_v16  ;;  %v2567_v22 = vmul.f32 -1.442695, %v671_v16 }
 0x96d   :  { %3071 = vtanh.f32 %v672_v19  ;;  %v2568_v23 = vmul.f32 -1.442695, %v672_v19 }
 0x96e   :  { %3073 = vpow2.f32 %v2567_v22 }
 0x96f   :  { %3075 = vpow2.f32 %v2568_v23 }
 0x975   :  { %v3070_v20 = vpop.eup %3069 }
 0x976   :  { %691 = vrot.lane.b32.xlu0 %v3070_v20, %s3379_s26 }
 0x977   :  { %v3072_v21 = vpop.eup %3071 }
 0x978   :  { %693 = vrot.lane.b32.xlu1 %v3072_v21, %s3379_s26  ;;  %v3074_v24 = vpop.eup %3073 }
 0x979   :  { %v3076_v25 = vpop.eup %3075  ;;  %v679_v26 = vadd.f32 1.0, %v3074_v24 }
 0x97a   :  { %v680_v27 = vadd.f32 1.0, %v3076_v25 }
 0x97b   :  { %3077 = vrcp.f32 %v679_v26 }
 0x97c   :  { %3079 = vrcp.f32 %v680_v27 }
 0x985   :  { %v3078_v28 = vpop.eup %3077 }
 0x986   :  { %v3080_v33 = vpop.eup %3079  ;;  %v687_v36 = vmul.f32 %v3078_v28, %v565_v60 }
 0x987   :  { %v688_v39 = vmul.f32 %v3080_v33, %v566_v63 }
 0x9e8   :  { %v692_v29 = vpop.permute.xlu0 %691 }
 0x9e9   :  { %v697_v32 = vmul.f32 %v3078_v28, %v692_v29 }
 0x9ea   :  { %v694_v34 = vpop.permute.xlu1 %693 }
 0x9eb   :  { %701 = vrot.lane.b32.xlu0 %v697_v32, %s3380_s27  ;;  %v698_v35 = vmul.f32 %v3080_v33, %v694_v34 }
 0x9ed   :  { %703 = vrot.lane.b32.xlu1 %v698_v35, %s3380_s27 }
 0xa5d   :  { %v702_v37 = vpop.permute.xlu0 %701 }
 0xa5e   :  { %v707_v38 = vadd.f32 %v702_v37, %v687_v36 }
 0xa5f   :  { %v704_v40 = vpop.permute.xlu1 %703 }
 0xa60   :  { %3081 = vtanh.f32 %v707_v38  ;;  %v708_v41 = vadd.f32 %v704_v40, %v688_v39 }
 0xa62   :  { %3083 = vtanh.f32 %v708_v41 }
 0xa6a   :  { %v3082_v42 = vpop.eup %3081 }
 0xa6b   :  { %713 = vrot.lane.b32.xlu0 %v3082_v42, %s3379_s26 }
 0xa6c   :  { %v3084_v43 = vpop.eup %3083 }
 0xa6d   :  { %715 = vrot.lane.b32.xlu1 %v3084_v43, %s3379_s26 }
 0xadd   :  { %v714_v44 = vpop.permute.xlu0 %713 }
 0xade   :  { %v3562_v47 = vmul.f32 %v3078_v28, %v714_v44 }
 0xadf   :  { %v716_v45 = vpop.permute.xlu1 %715 }
 0xae0   :  { %v3560_v46 = vmul.f32 %v3080_v33, %v716_v45  ;;  %v873_v33 = vld [vmem:[#allocation3 + $0x5] sm:$0x1] }
 0xae2   :  { %v733_v48 = vrot.slane %v3560_v46, 7 }
 0xae4   :  { %v734_v49 = vsel %vm307_vm2, %v733_v48, %v3562_v47 }
 0xae5   :  { %735 = vrot.lane.b32.xlu1 %v734_v49, %s3380_s27 }
 0xb57   :  { %v736_v50 = vpop.permute.xlu1 %735 }
 0xb58   :  { %2764 = vmatmul.mubr.msk.f32.vlgmr.msra.gmra.mrb[4].mxu1 %vm61_vm1, %v736_v50 }
 0xb59   :  { %2944 = vmatpush3.bf16.msra.mxu1 %v3464_v13  ;;  %2785 = vmatprep.mubr.msk.f32.mxu1 %vm3377_vm0, %v3378_v1 }
 0xb5a   :  { %2945 = vmatprep.subr.bf16.mxu1 %v3376_v0 }
 0xb5d   :  { %2947 = vmatpush3.bf16.msra.mxu1 %v3467_v15 }
 0xc2b   :  { %v805_v52 = vpop.f32.mrb[4].mxu1 }
 0xc2c   :  { %v810_v54 = vrot.slane %v805_v52, 1  ;;  %v813_v55 = vadd.f32 %v805_v52, %v731_v51  ;;  %v2765_v57 = vpop.f32.mrb[5].mxu1 }
 0xc2e   :  { %v814_v59 = vadd.f32 %v810_v54, %v732_v58  ;;  %3085 = vtanh.f32 %v813_v55  ;;  %v2570_v62 = vmul.f32 -1.442695, %v813_v55 }
 0xc30   :  { %3087 = vtanh.f32 %v814_v59  ;;  %v2571_v63 = vmul.f32 -1.442695, %v814_v59 }
 0xc31   :  { %3089 = vpow2.f32 %v2570_v62 }
 0xc32   :  { %3091 = vpow2.f32 %v2571_v63 }
 0xc38   :  { %v3086_v60 = vpop.eup %3085 }
 0xc39   :  { %833 = vrot.lane.b32.xlu1 %v3086_v60, %s3379_s26 }
 0xc3a   :  { %v3088_v61 = vpop.eup %3087 }
 0xc3b   :  { %835 = vrot.lane.b32.xlu0 %v3088_v61, %s3379_s26  ;;  %v3090_v2 = vpop.eup %3089 }
 0xc3c   :  { %v3092_v3 = vpop.eup %3091  ;;  %v821_v4 = vadd.f32 1.0, %v3090_v2 }
 0xc3d   :  { %v822_v5 = vadd.f32 1.0, %v3092_v3 }
 0xc3e   :  { %3093 = vrcp.f32 %v821_v4 }
 0xc3f   :  { %3095 = vrcp.f32 %v822_v5 }
 0xc48   :  { %v3094_v8 = vpop.eup %3093 }
 0xc49   :  { %v3096_v11 = vpop.eup %3095  ;;  %v829_v16 = vmul.f32 %v3094_v8, %v707_v38  ;;  %v874_v38 = vld [vmem:[#allocation3 + $0xd] sm:$0x1] }
 0xc4a   :  { %v830_v19 = vmul.f32 %v3096_v11, %v708_v41 }
 0xcab   :  { %v834_v9 = vpop.permute.xlu1 %833 }
 0xcac   :  { %v839_v10 = vmul.f32 %v3094_v8, %v834_v9 }
 0xcad   :  { %v836_v12 = vpop.permute.xlu0 %835 }
 0xcae   :  { %843 = vrot.lane.b32.xlu1 %v839_v10, %s3380_s27  ;;  %v840_v14 = vmul.f32 %v3096_v11, %v836_v12 }
 0xcb0   :  { %845 = vrot.lane.b32.xlu0 %v840_v14, %s3380_s27 }
 0xd20   :  { %v844_v17 = vpop.permute.xlu1 %843 }
 0xd21   :  { %v849_v18 = vadd.f32 %v844_v17, %v829_v16 }
 0xd22   :  { %v846_v20 = vpop.permute.xlu0 %845 }
 0xd23   :  { %3097 = vtanh.f32 %v849_v18  ;;  %v850_v21 = vadd.f32 %v846_v20, %v830_v19 }
 0xd25   :  { %3099 = vtanh.f32 %v850_v21 }
 0xd2d   :  { %v3098_v22 = vpop.eup %3097 }
 0xd2e   :  { %855 = vrot.lane.b32.xlu1 %v3098_v22, %s3379_s26 }
 0xd2f   :  { %v3100_v23 = vpop.eup %3099 }
 0xd30   :  { %857 = vrot.lane.b32.xlu0 %v3100_v23, %s3379_s26 }
 0xda0   :  { %v856_v24 = vpop.permute.xlu1 %855 }
 0xda1   :  { %v3582_v27 = vmul.f32 %v3094_v8, %v856_v24 }
 0xda2   :  { %v858_v25 = vpop.permute.xlu0 %857 }
 0xda3   :  { %v3580_v26 = vmul.f32 %v3096_v11, %v858_v25  ;;  %v1015_v11 = vld [vmem:[#allocation3 + $0x6] sm:$0x1] }
 0xda5   :  { %v875_v28 = vrot.slane %v3580_v26, 7 }
 0xda7   :  { %v876_v29 = vsel %vm307_vm2, %v875_v28, %v3582_v27 }
 0xda8   :  { %877 = vrot.lane.b32.xlu0 %v876_v29, %s3380_s27 }
 0xe1a   :  { %v878_v32 = vpop.permute.xlu0 %877 }
 0xe1b   :  { %2775 = vmatmul.mubr.msk.f32.vlgmr.msra.gmra.mrb[6].mxu0 %vm61_vm1, %v878_v32 }
 0xe1c   :  { %2950 = vmatpush3.bf16.msra.mxu0 %v3464_v13  ;;  %2796 = vmatprep.mubr.msk.f32.mxu0 %vm3377_vm0, %v3378_v1 }
 0xe1d   :  { %2951 = vmatprep.subr.bf16.mxu0 %v3376_v0 }
 0xe20   :  { %2953 = vmatpush3.bf16.msra.mxu0 %v3467_v15 }
 0xe21   :  { %2962 = vmatprep.subr.bf16.mxu0 %v3376_v0 }
 0xeee   :  { %v947_v34 = vpop.f32.mrb[6].mxu0 }
 0xeef   :  { %v952_v35 = vrot.slane %v947_v34, 1  ;;  %v955_v36 = vadd.f32 %v947_v34, %v873_v33  ;;  %v2776_v37 = vpop.f32.mrb[7].mxu0 }
 0xef1   :  { %v956_v39 = vadd.f32 %v952_v35, %v874_v38  ;;  %3101 = vtanh.f32 %v955_v36  ;;  %v2573_v41 = vmul.f32 -1.442695, %v955_v36 }
 0xef3   :  { %3103 = vtanh.f32 %v956_v39  ;;  %v2574_v42 = vmul.f32 -1.442695, %v956_v39 }
 0xef4   :  { %3105 = vpow2.f32 %v2573_v41 }
 0xef5   :  { %3107 = vpow2.f32 %v2574_v42 }
 0xefb   :  { %v3102_v40 = vpop.eup %3101 }
 0xefc   :  { %975 = vrot.lane.b32.xlu0 %v3102_v40, %s3379_s26 }
 0xefd   :  { %v3104_v13 = vpop.eup %3103 }
 0xefe   :  { %977 = vrot.lane.b32.xlu1 %v3104_v13, %s3379_s26  ;;  %v3106_v15 = vpop.eup %3105 }
 0xeff   :  { %v3108_v43 = vpop.eup %3107  ;;  %v963_v44 = vadd.f32 1.0, %v3106_v15 }
 0xf00   :  { %v964_v45 = vadd.f32 1.0, %v3108_v43 }
 0xf01   :  { %3109 = vrcp.f32 %v963_v44 }
 0xf02   :  { %3111 = vrcp.f32 %v964_v45 }
 0xf0b   :  { %v3110_v48 = vpop.eup %3109 }
 0xf0c   :  { %v3112_v51 = vpop.eup %3111  ;;  %v971_v55 = vmul.f32 %v3110_v48, %v849_v18  ;;  %v1016_v18 = vld [vmem:[#allocation3 + $0xe] sm:$0x1] }
 0xf0d   :  { %v972_v59 = vmul.f32 %v3112_v51, %v850_v21 }
 0xf6e   :  { %v976_v49 = vpop.permute.xlu0 %975 }
 0xf6f   :  { %v981_v50 = vmul.f32 %v3110_v48, %v976_v49 }
 0xf70   :  { %v978_v52 = vpop.permute.xlu1 %977 }
 0xf71   :  { %985 = vrot.lane.b32.xlu0 %v981_v50, %s3380_s27  ;;  %v982_v54 = vmul.f32 %v3112_v51, %v978_v52 }
 0xf73   :  { %987 = vrot.lane.b32.xlu1 %v982_v54, %s3380_s27  ;;  %v1157_v54 = vld [vmem:[#allocation3 + $0x7] sm:$0x1] }
 0xfe3   :  { %v986_v57 = vpop.permute.xlu0 %985 }
 0xfe4   :  { %v991_v58 = vadd.f32 %v986_v57, %v971_v55 }
 0xfe5   :  { %v988_v60 = vpop.permute.xlu1 %987 }
 0xfe6   :  { %3113 = vtanh.f32 %v991_v58  ;;  %v992_v61 = vadd.f32 %v988_v60, %v972_v59  ;;  %v1158_v60 = vld [vmem:[#allocation3 + $0xf] sm:$0x1] }
 0xfe8   :  { %3115 = vtanh.f32 %v992_v61 }
 0xff0   :  { %v3114_v62 = vpop.eup %3113 }
 0xff1   :  { %997 = vrot.lane.b32.xlu0 %v3114_v62, %s3379_s26 }
 0xff2   :  { %v3116_v63 = vpop.eup %3115 }
 0xff3   :  { %999 = vrot.lane.b32.xlu1 %v3116_v63, %s3379_s26 }
0x1063   :  { %v998_v2 = vpop.permute.xlu0 %997 }
0x1064   :  { %v3603_v5 = vmul.f32 %v3110_v48, %v998_v2 }
0x1065   :  { %v1000_v3 = vpop.permute.xlu1 %999 }
0x1066   :  { %v3601_v4 = vmul.f32 %v3112_v51, %v1000_v3 }
0x1068   :  { %v1017_v8 = vrot.slane %v3601_v4, 7 }
0x106a   :  { %v1018_v9 = vsel %vm307_vm2, %v1017_v8, %v3603_v5 }
0x106b   :  { %1019 = vrot.lane.b32.xlu1 %v1018_v9, %s3380_s27 }
0x10dd   :  { %v1020_v10 = vpop.permute.xlu1 %1019 }
0x10de   :  { %2786 = vmatmul.mubr.msk.f32.vlgmr.msra.gmra.mrb[6].mxu1 %vm61_vm1, %v1020_v10 }
0x11b1   :  { %v1089_v12 = vpop.f32.mrb[6].mxu1 }
0x11b2   :  { %v1094_v14 = vrot.slane %v1089_v12, 1  ;;  %v1097_v16 = vadd.f32 %v1089_v12, %v1015_v11  ;;  %v2787_v17 = vpop.f32.mrb[7].mxu1 }
0x11b4   :  { %v1098_v19 = vadd.f32 %v1094_v14, %v1016_v18  ;;  %3117 = vtanh.f32 %v1097_v16  ;;  %v2576_v22 = vmul.f32 -1.442695, %v1097_v16 }
0x11b6   :  { %3119 = vtanh.f32 %v1098_v19  ;;  %v2577_v23 = vmul.f32 -1.442695, %v1098_v19 }
0x11b7   :  { %3121 = vpow2.f32 %v2576_v22 }
0x11b8   :  { %3123 = vpow2.f32 %v2577_v23 }
0x11be   :  { %v3118_v20 = vpop.eup %3117 }
0x11bf   :  { %1117 = vrot.lane.b32.xlu1 %v3118_v20, %s3379_s26 }
0x11c0   :  { %v3120_v21 = vpop.eup %3119 }
0x11c1   :  { %1119 = vrot.lane.b32.xlu0 %v3120_v21, %s3379_s26  ;;  %v3122_v24 = vpop.eup %3121 }
0x11c2   :  { %v3124_v25 = vpop.eup %3123  ;;  %v1105_v28 = vadd.f32 1.0, %v3122_v24 }
0x11c3   :  { %v1106_v29 = vadd.f32 1.0, %v3124_v25 }
0x11c4   :  { %3125 = vrcp.f32 %v1105_v28 }
0x11c5   :  { %3127 = vrcp.f32 %v1106_v29 }
0x11ce   :  { %v3126_v32 = vpop.eup %3125 }
0x11cf   :  { %v3128_v35 = vpop.eup %3127  ;;  %v1113_v38 = vmul.f32 %v3126_v32, %v991_v58 }
0x11d0   :  { %v1114_v13 = vmul.f32 %v3128_v35, %v992_v61 }
0x1231   :  { %v1118_v33 = vpop.permute.xlu1 %1117 }
0x1232   :  { %v1123_v34 = vmul.f32 %v3126_v32, %v1118_v33 }
0x1233   :  { %v1120_v36 = vpop.permute.xlu0 %1119 }
0x1234   :  { %1127 = vrot.lane.b32.xlu1 %v1123_v34, %s3380_s27  ;;  %v1124_v37 = vmul.f32 %v3128_v35, %v1120_v36 }
0x1236   :  { %1129 = vrot.lane.b32.xlu0 %v1124_v37, %s3380_s27 }
0x12a6   :  { %v1128_v39 = vpop.permute.xlu1 %1127 }
0x12a7   :  { %v1133_v40 = vadd.f32 %v1128_v39, %v1113_v38 }
0x12a8   :  { %v1130_v41 = vpop.permute.xlu0 %1129 }
0x12a9   :  { %3129 = vtanh.f32 %v1133_v40  ;;  %v1134_v42 = vadd.f32 %v1130_v41, %v1114_v13 }
0x12ab   :  { %3131 = vtanh.f32 %v1134_v42 }
0x12b3   :  { %v3130_v15 = vpop.eup %3129 }
0x12b4   :  { %1139 = vrot.lane.b32.xlu1 %v3130_v15, %s3379_s26 }
0x12b5   :  { %v3132_v43 = vpop.eup %3131 }
0x12b6   :  { %1141 = vrot.lane.b32.xlu0 %v3132_v43, %s3379_s26 }
0x1326   :  { %v1140_v44 = vpop.permute.xlu1 %1139 }
0x1327   :  { %v1145_v49 = vmul.f32 %v3126_v32, %v1140_v44  ;;  %v1308_v32 = vld [vmem:[#allocation9 + $0x38] sm:$0xff] }
0x1328   :  { %v1142_v45 = vpop.permute.xlu0 %1141 }
0x1329   :  { %v3616_v48 = vmul.f32 %v3128_v35, %v1142_v45 }
0x132b   :  { %v1159_v50 = vrot.slane %v3616_v48, 7 }
0x132d   :  { %v1160_v51 = vsel %vm307_vm2, %v1159_v50, %v1145_v49 }
0x132e   :  { %1161 = vrot.lane.b32.xlu0 %v1160_v51, %s3380_s27 }
0x13a0   :  { %v1162_v52 = vpop.permute.xlu0 %1161 }
0x13a1   :  { %2797 = vmatmul.mubr.msk.f32.vlgmr.msra.gmra.mrb[8].mxu0 %vm61_vm1, %v1162_v52 }
0x13a2   :  { %2818 = vmatprep.mubr.msk.f32.mxu0 %vm3377_vm0, %v3378_v1 }
0x1474   :  { %v1231_v55 = vpop.f32.mrb[8].mxu0 }
0x1475   :  { %v1236_v57 = vrot.slane %v1231_v55, 1  ;;  %v1239_v58 = vadd.f32 %v1231_v55, %v1157_v54  ;;  %v2798_v59 = vpop.f32.mrb[9].mxu0 }
0x1477   :  { %v1240_v61 = vadd.f32 %v1236_v57, %v1158_v60  ;;  %3133 = vtanh.f32 %v1239_v58  ;;  %v2579_v2 = vmul.f32 -1.442695, %v1239_v58  ;;  %v2582_v58 = vld [vmem:[%s3896_s3 + $0x1] ss:$0 sm:$0xff]  ;;  %s3381_s3 = smov [#allocation10]  }
0x1478   :  { %s2545_s30 = sshll.u32 %s3381_s3, 4  ;;  %s2546_s30 = int_to_ptr.vmem [resolvable:$true] %s2545_s30 }
0x1479   :  { %3135 = vtanh.f32 %v1240_v61  ;;  %v2580_v3 = vmul.f32 -1.442695, %v1240_v61  ;;  %s3343_s5 = scalar_lea.vmem %s2546_s30, 32  ;;  %p3348_p11 = scmp.lt.s32.totalorder %s2546_s30, %s2546_s30 }
0x147a   :  { %3137 = vpow2.f32 %v2579_v2  ;;  %p3344_p10 = scmp.ne.s32.totalorder %s2546_s30, %s3343_s5  ;;  %p3349_p12 = scmp.lt.s32.totalorder %s3343_s5, %s3343_s5 }
0x147b   :  { %3139 = vpow2.f32 %v2580_v3 }
0x147c   :  { %p3350_p13 = por %p3349_p12, %p3348_p11 }
0x147e   :  { %p3351_p0 = pnand %p3350_p13, %p3344_p10 }
0x1481   :  { %v3134_v62 = vpop.eup %3133 }
0x1482   :  { %1259 = vrot.lane.b32.xlu1 %v3134_v62, %s3379_s26 }
0x1483   :  { %v3136_v63 = vpop.eup %3135 }
0x1484   :  { %1261 = vrot.lane.b32.xlu0 %v3136_v63, %s3379_s26  ;;  %v3138_v8 = vpop.eup %3137 }
0x1485   :  { %v3140_v9 = vpop.eup %3139  ;;  %v1247_v10 = vadd.f32 1.0, %v3138_v8 }
0x1486   :  { %v1248_v11 = vadd.f32 1.0, %v3140_v9 }
0x1487   :  { %3141 = vrcp.f32 %v1247_v10 }
0x1488   :  { %3143 = vrcp.f32 %v1248_v11 }
0x1491   :  { %v3142_v12 = vpop.eup %3141 }
0x1492   :  { %v3144_v17 = vpop.eup %3143  ;;  %v1255_v20 = vmul.f32 %v3142_v12, %v1133_v40 }
0x1493   :  { %v1256_v23 = vmul.f32 %v3144_v17, %v1134_v42 }
0x14f4   :  { %v1260_v14 = vpop.permute.xlu1 %1259 }
0x14f5   :  { %v1265_v16 = vmul.f32 %v3142_v12, %v1260_v14 }
0x14f6   :  { %v1262_v18 = vpop.permute.xlu0 %1261 }
0x14f7   :  { %1269 = vrot.lane.b32.xlu1 %v1265_v16, %s3380_s27  ;;  %v1266_v19 = vmul.f32 %v3144_v17, %v1262_v18 }
0x14f9   :  { %1271 = vrot.lane.b32.xlu0 %v1266_v19, %s3380_s27 }
0x1569   :  { %v1270_v21 = vpop.permute.xlu1 %1269 }
0x156a   :  { %v1275_v22 = vadd.f32 %v1270_v21, %v1255_v20 }
0x156b   :  { %v1272_v24 = vpop.permute.xlu0 %1271 }
0x156c   :  { %3145 = vtanh.f32 %v1275_v22  ;;  %v1276_v25 = vadd.f32 %v1272_v24, %v1256_v23 }
0x156e   :  { %3147 = vtanh.f32 %v1276_v25 }
0x1576   :  { %v3146_v28 = vpop.eup %3145 }
0x1577   :  { %1281 = vrot.lane.b32.xlu1 %v3146_v28, %s3379_s26 }
0x1578   :  { %v3148_v29 = vpop.eup %3147 }
0x1579   :  { %1283 = vrot.lane.b32.xlu0 %v3148_v29, %s3379_s26 }
0x157b   :  { %295 = vrot.lane.b32.xlu1 %v3500_v56, %s3380_s27  ;;  %v1300_v56 = vld [vmem:[#allocation7 + $0x20] sm:$0xff] }
0x157d   :  { %439 = vrot.lane.b32.xlu0 %v3520_v31, %s3380_s27 }
0x157f   :  { %581 = vrot.lane.b32.xlu1 %v3541_v7, %s3380_s27  ;;  %v1302_v7 = vld [vmem:[#allocation7 + $0x30] sm:$0xff] }
0x1581   :  { %723 = vrot.lane.b32.xlu0 %v3562_v47, %s3380_s27 }
0x1583   :  { %865 = vrot.lane.b32.xlu1 %v3582_v27, %s3380_s27  ;;  %v1306_v27 = vld [vmem:[#allocation9 + $0x28] sm:$0xff] }
0x1585   :  { %1007 = vrot.lane.b32.xlu0 %v3603_v5, %s3380_s27 }
0x1587   :  { %1149 = vrot.lane.b32.xlu1 %v1145_v49, %s3380_s27 }
0x1589   :  { %441 = vrot.lane.b32.xlu0 %v3518_v30, %s3380_s27  ;;  %v1301_v30 = vld [vmem:[#allocation7 + $0x28] sm:$0xff] }
0x158a   :  { %v2954_v31 = vpack.c.bf16 %v1301_v30, %v1300_v56 }
0x158b   :  { %297 = vrot.lane.b32.xlu1 %v3497_v53, %s3380_s27  ;;  %v1303_v53 = vld [vmem:[#allocation7 + $0x38] sm:$0xff] }
0x158c   :  { %2955 = vmatprep.subr.bf16.mxu1 %v2954_v31  ;;  %v2958_v47 = vpack.c.bf16 %v1303_v53, %v1302_v7 }
0x158d   :  { %725 = vrot.lane.b32.xlu0 %v3560_v46, %s3380_s27  ;;  %2957 = vmatpush3.bf16.msra.mxu1 %v2954_v31 }
0x158e   :  { %2959 = vmatprep.subr.bf16.mxu1 %v2958_v47 }
0x158f   :  { %583 = vrot.lane.b32.xlu1 %v3539_v6, %s3380_s27  ;;  %v1305_v6 = vld [vmem:[#allocation9 + $0x20] sm:$0xff] }
0x1590   :  { %v3657_v5 = vpack.c.bf16 %v1306_v27, %v1305_v6 }
0x1591   :  { %1009 = vrot.lane.b32.xlu0 %v3601_v4, %s3380_s27  ;;  %2961 = vmatpush3.bf16.msra.mxu1 %v2958_v47 }
0x1592   :  { %2968 = vmatprep.subr.bf16.mxu1 %v3376_v0  ;;  %2964 = vmatpush3.bf16.msra.mxu0 %v3657_v5 }
0x1593   :  { %867 = vrot.lane.b32.xlu1 %v3580_v26, %s3380_s27  ;;  %v1307_v26 = vld [vmem:[#allocation9 + $0x30] sm:$0xff]  ;;  %2965 = vmatprep.subr.bf16.mxu0 %v3376_v0 }
0x1594   :  { %v3662_v34 = vpack.c.bf16 %v1308_v32, %v1307_v26 }
0x1596   :  { %2967 = vmatpush3.bf16.msra.mxu0 %v3662_v34 }
0x1597   :  { %1151 = vrot.lane.b32.xlu1 %v3616_v48, %s3380_s27  ;;  %2974 = vmatprep.subr.bf16.mxu0 %v3376_v0 }
0x1599   :  { %2819 = vmatmul.mubr.f32.vlgmr.msra.gmra.mrb[10].mxu0 %v3378_v1 }
0x159a   :  { %2976 = vmatpush3.bf16.msra.mxu0 %v3657_v5  ;;  %2840 = vmatprep.mubr.msk.f32.mxu0 %vm3377_vm0, %v3378_v1 }
0x159b   :  { %2977 = vmatprep.subr.bf16.mxu0 %v3376_v0 }
0x159e   :  { %2979 = vmatpush3.bf16.msra.mxu0 %v3662_v34 }
0x159f   :  { %2986 = vmatprep.subr.bf16.mxu0 %v3376_v0 }
0x15e9   :  { %v1282_v46 = vpop.permute.xlu1 %1281 }
0x15ea   :  { %v1287_v4 = vmul.f32 %v3142_v12, %v1282_v46 }
0x15eb   :  { %v1284_v33 = vpop.permute.xlu0 %1283 }
0x15ec   :  { %1291 = vrot.lane.b32.xlu0 %v1287_v4, %s3380_s27  ;;  %v1288_v36 = vmul.f32 %v3144_v17, %v1284_v33 }
0x15ed   :  { %v296_v35 = vpop.permute.xlu1 %295 }
0x15ee   :  { %302 = vst.msk [vmem:[#allocation2] sm:$0x1] %vm301_vm3, %v296_v35 }
0x15ef   :  { %v440_v37 = vpop.permute.xlu0 %439 }
0x15f0   :  { %1293 = vrot.lane.b32.xlu0 %v1288_v36, %s3380_s27  ;;  %445 = vst.msk [vmem:[#allocation2 + $0x1] sm:$0x1] %vm301_vm3, %v440_v37 }
0x15f1   :  { %v582_v38 = vpop.permute.xlu1 %581 }
0x15f2   :  { %587 = vst.msk [vmem:[#allocation2 + $0x2] sm:$0x1] %vm301_vm3, %v582_v38 }
0x15f3   :  { %v724_v39 = vpop.permute.xlu0 %723 }
0x15f4   :  { %729 = vst.msk [vmem:[#allocation2 + $0x3] sm:$0x1] %vm301_vm3, %v724_v39 }
0x15f5   :  { %v866_v40 = vpop.permute.xlu1 %865 }
0x15f6   :  { %871 = vst.msk [vmem:[#allocation2 + $0x4] sm:$0x1] %vm301_vm3, %v866_v40 }
0x15f7   :  { %v1008_v13 = vpop.permute.xlu0 %1007 }
0x15f8   :  { %1013 = vst.msk [vmem:[#allocation2 + $0x5] sm:$0x1] %vm301_vm3, %v1008_v13 }
0x15f9   :  { %v1150_v41 = vpop.permute.xlu1 %1149 }
0x15fa   :  { %1155 = vst.msk [vmem:[#allocation2 + $0x6] sm:$0x1] %vm301_vm3, %v1150_v41 }
0x15fb   :  { %v442_v42 = vpop.permute.xlu0 %441 }
0x15fc   :  { %446 = vst.msk [vmem:[#allocation2 + $0x9] sm:$0x1] %vm301_vm3, %v442_v42 }
0x15fd   :  { %v298_v15 = vpop.permute.xlu1 %297 }
0x15fe   :  { %303 = vst.msk [vmem:[#allocation2 + $0x8] sm:$0x1] %vm301_vm3, %v298_v15 }
0x15ff   :  { %v726_v43 = vpop.permute.xlu0 %725 }
0x1600   :  { %730 = vst.msk [vmem:[#allocation2 + $0xb] sm:$0x1] %vm301_vm3, %v726_v43 }
0x1601   :  { %v584_v44 = vpop.permute.xlu1 %583 }
0x1602   :  { %588 = vst.msk [vmem:[#allocation2 + $0xa] sm:$0x1] %vm301_vm3, %v584_v44 }
0x1603   :  { %v1010_v45 = vpop.permute.xlu0 %1009 }
0x1604   :  { %1014 = vst.msk [vmem:[#allocation2 + $0xd] sm:$0x1] %vm301_vm3, %v1010_v45 }
0x1605   :  { %v868_v48 = vpop.permute.xlu1 %867 }
0x1606   :  { %872 = vst.msk [vmem:[#allocation2 + $0xc] sm:$0x1] %vm301_vm3, %v868_v48 }
0x1609   :  { %v1152_v49 = vpop.permute.xlu1 %1151 }
0x160a   :  { %1156 = vst.msk [vmem:[#allocation2 + $0xe] sm:$0x1] %vm301_vm3, %v1152_v49 }
0x165e   :  { %v1292_v50 = vpop.permute.xlu0 %1291 }
0x165f   :  { %1297 = vst.msk [vmem:[#allocation2 + $0x7] sm:$0x1] %vm301_vm3, %v1292_v50 }
0x1662   :  { %v1294_v51 = vpop.permute.xlu0 %1293 }
0x1663   :  { %1298 = vst.msk [vmem:[#allocation2 + $0xf] sm:$0x1] %vm301_vm3, %v1294_v51 }
0x1666   :  { %v1311_v52 = vld [vmem:[#allocation2] sm:$0xff] }
0x1667   :  { %2807 = vmatprep.mubr.msk.f32.mxu1 %vm61_vm1, %v1311_v52 }
0x166a   :  { %v1312_v54 = vld [vmem:[#allocation2 + $0x8] sm:$0xff] }
0x166b   :  { %2808 = vmatmul.mubr.msk.f32.vlgmr.msra.gmra.mrb[8].mxu1 %vm61_vm1, %v1312_v54 }
0x166c   :  { %2970 = vmatpush3.bf16.msra.mxu1 %v3657_v5  ;;  %2829 = vmatprep.mubr.msk.f32.mxu1 %vm3377_vm0, %v3378_v1  ;;  %v1470_v55 = vpop.f32.mrb[10].mxu0 }
0x166d   :  { %2971 = vmatprep.subr.bf16.mxu1 %v3376_v0  ;;  %v2820_v57 = vpop.f32.mrb[11].mxu0  ;;  %v1475_v63 = vrot.slane %v1470_v55, 1 }
0x1670   :  { %2973 = vmatpush3.bf16.msra.mxu1 %v3662_v34 }
0x1671   :  { %2980 = vmatprep.subr.bf16.mxu1 %v3376_v0 }
0x173e   :  { %v2809_v59 = vpop.f32.mrb[8].mxu1 }
0x173f   :  { %v1397_v60 = vadd.f32 %v2809_v59, %v2582_v58  ;;  %v1391_v61 = vpop.f32.mrb[9].mxu1 }
0x1740   :  { %v1392_v62 = vadd.f32 %v2582_v58, %v1391_v61 }
0x1741   :  { %1401 = vst [vmem:[#allocation3 + $0x8] sm:$0xff] %v1397_v60 }
0x1742   :  { %1400 = vst [vmem:[#allocation3] sm:$0xff] %v1392_v62 }
0x1748   :  { %v1403_v2 = vld [vmem:[#allocation3 + $0x8] sm:$0x1]  ;;  %v1539_v40 = vld [vmem:[#allocation3 + $0x9] sm:$0x1] }
0x1749   :  { %v1402_v3 = vld [vmem:[#allocation3] sm:$0x1]  ;;  %v1479_v8 = vadd.f32 %v1475_v63, %v1403_v2  ;;  %v1538_v35 = vld [vmem:[#allocation3 + $0x1] sm:$0x1] }
0x174a   :  { %v1478_v9 = vadd.f32 %v1470_v55, %v1402_v3 }
0x174b   :  { %3149 = vtanh.f32 %v1479_v8  ;;  %v2586_v12 = vmul.f32 -1.442695, %v1479_v8 }
0x174c   :  { %3151 = vtanh.f32 %v1478_v9  ;;  %v2585_v14 = vmul.f32 -1.442695, %v1478_v9 }
0x174d   :  { %3153 = vpow2.f32 %v2586_v12 }
0x174e   :  { %3155 = vpow2.f32 %v2585_v14 }
0x1755   :  { %v3150_v10 = vpop.eup %3149 }
0x1756   :  { %v3152_v11 = vpop.eup %3151  ;;  %1500 = vrot.lane.b32.xlu1 %v3150_v10, %s3379_s26 }
0x1757   :  { %1498 = vrot.lane.b32.xlu0 %v3152_v11, %s3379_s26  ;;  %v3154_v16 = vpop.eup %3153 }
0x1758   :  { %v3156_v17 = vpop.eup %3155  ;;  %v1487_v18 = vadd.f32 1.0, %v3154_v16 }
0x1759   :  { %v1486_v19 = vadd.f32 1.0, %v3156_v17  ;;  %v1680_v17 = vld [vmem:[#allocation3 + $0x2] sm:$0x1] }
0x175a   :  { %3157 = vrcp.f32 %v1487_v18 }
0x175b   :  { %3159 = vrcp.f32 %v1486_v19 }
0x1764   :  { %v3158_v20 = vpop.eup %3157 }
0x1765   :  { %v3160_v22 = vpop.eup %3159  ;;  %v1495_v28 = vmul.f32 0.0, %v3158_v20 }
0x1766   :  { %v1494_v56 = vmul.f32 0.0, %v3160_v22 }
0x17c8   :  { %v1501_v21 = vpop.permute.xlu1 %1500 }
0x17c9   :  { %v1505_v23 = vmul.f32 %v3158_v20, %v1501_v21  ;;  %v1499_v24 = vpop.permute.xlu0 %1498 }
0x17ca   :  { %v1504_v25 = vmul.f32 %v3160_v22, %v1499_v24 }
0x17cb   :  { %1510 = vrot.lane.b32.xlu1 %v1505_v23, %s3380_s27 }
0x17cc   :  { %1508 = vrot.lane.b32.xlu0 %v1504_v25, %s3380_s27 }
0x183d   :  { %v1511_v29 = vpop.permute.xlu1 %1510 }
0x183e   :  { %v1515_v30 = vadd.f32 %v1511_v29, %v1495_v28  ;;  %v1509_v31 = vpop.permute.xlu0 %1508 }
0x183f   :  { %v1514_v7 = vadd.f32 %v1509_v31, %v1494_v56 }
0x1840   :  { %3161 = vtanh.f32 %v1515_v30 }
0x1841   :  { %3163 = vtanh.f32 %v1514_v7 }
0x184a   :  { %v3162_v53 = vpop.eup %3161 }
0x184b   :  { %v3164_v47 = vpop.eup %3163  ;;  %1522 = vrot.lane.b32.xlu1 %v3162_v53, %s3379_s26 }
0x184c   :  { %1520 = vrot.lane.b32.xlu0 %v3164_v47, %s3379_s26 }
0x18bd   :  { %v1523_v46 = vpop.permute.xlu1 %1522 }
0x18be   :  { %v3708_v6 = vmul.f32 %v3158_v20, %v1523_v46  ;;  %v1521_v27 = vpop.permute.xlu0 %1520 }
0x18bf   :  { %v3710_v4 = vmul.f32 %v3160_v22, %v1521_v27  ;;  %v1681_v22 = vld [vmem:[#allocation3 + $0xa] sm:$0x1] }
0x18c0   :  { %v1540_v26 = vrot.slane %v3708_v6, 7 }
0x18c2   :  { %v1541_v32 = vsel %vm307_vm2, %v1540_v26, %v3710_v4 }
0x18c3   :  { %1542 = vrot.lane.b32.xlu1 %v1541_v32, %s3380_s27 }
0x1935   :  { %v1543_v33 = vpop.permute.xlu1 %1542 }
0x1936   :  { %2830 = vmatmul.mubr.msk.f32.vlgmr.msra.gmra.mrb[10].mxu1 %vm61_vm1, %v1543_v33 }
0x1937   :  { %2982 = vmatpush3.bf16.msra.mxu1 %v3657_v5  ;;  %2851 = vmatprep.mubr.msk.f32.mxu1 %vm3377_vm0, %v3378_v1 }
0x1938   :  { %2983 = vmatprep.subr.bf16.mxu1 %v3376_v0 }
0x193b   :  { %2985 = vmatpush3.bf16.msra.mxu1 %v3662_v34 }
0x193c   :  { %2992 = vmatprep.subr.bf16.mxu1 %v3376_v0 }
0x1a09   :  { %v1612_v36 = vpop.f32.mrb[10].mxu1 }
0x1a0a   :  { %v1617_v37 = vrot.slane %v1612_v36, 1  ;;  %v1620_v38 = vadd.f32 %v1612_v36, %v1538_v35  ;;  %v2831_v39 = vpop.f32.mrb[11].mxu1 }
0x1a0c   :  { %v1621_v13 = vadd.f32 %v1617_v37, %v1539_v40  ;;  %3165 = vtanh.f32 %v1620_v38  ;;  %v2588_v15 = vmul.f32 -1.442695, %v1620_v38 }
0x1a0e   :  { %3167 = vtanh.f32 %v1621_v13  ;;  %v2589_v43 = vmul.f32 -1.442695, %v1621_v13 }
0x1a0f   :  { %3169 = vpow2.f32 %v2588_v15 }
0x1a10   :  { %3171 = vpow2.f32 %v2589_v43 }
0x1a16   :  { %v3166_v41 = vpop.eup %3165 }
0x1a17   :  { %1640 = vrot.lane.b32.xlu1 %v3166_v41, %s3379_s26 }
0x1a18   :  { %v3168_v42 = vpop.eup %3167 }
0x1a19   :  { %1642 = vrot.lane.b32.xlu0 %v3168_v42, %s3379_s26  ;;  %v3170_v44 = vpop.eup %3169 }
0x1a1a   :  { %v3172_v45 = vpop.eup %3171  ;;  %v1628_v48 = vadd.f32 1.0, %v3170_v44 }
0x1a1b   :  { %v1629_v49 = vadd.f32 1.0, %v3172_v45 }
0x1a1c   :  { %3173 = vrcp.f32 %v1628_v48 }
0x1a1d   :  { %3175 = vrcp.f32 %v1629_v49  ;;  %v1822_v49 = vld [vmem:[#allocation3 + $0x3] sm:$0x1] }
0x1a26   :  { %v3174_v50 = vpop.eup %3173 }
0x1a27   :  { %v3176_v54 = vpop.eup %3175  ;;  %v1636_v58 = vmul.f32 %v3174_v50, %v1514_v7 }
0x1a28   :  { %v1637_v61 = vmul.f32 %v3176_v54, %v1515_v30 }
0x1a89   :  { %v1641_v51 = vpop.permute.xlu1 %1640 }
0x1a8a   :  { %v1646_v52 = vmul.f32 %v3174_v50, %v1641_v51 }
0x1a8b   :  { %v1643_v55 = vpop.permute.xlu0 %1642 }
0x1a8c   :  { %1650 = vrot.lane.b32.xlu1 %v1646_v52, %s3380_s27  ;;  %v1647_v57 = vmul.f32 %v3176_v54, %v1643_v55  ;;  %v1823_v55 = vld [vmem:[#allocation3 + $0xb] sm:$0x1] }
0x1a8e   :  { %1652 = vrot.lane.b32.xlu0 %v1647_v57, %s3380_s27 }
0x1afe   :  { %v1651_v59 = vpop.permute.xlu1 %1650 }
0x1aff   :  { %v1656_v60 = vadd.f32 %v1651_v59, %v1636_v58 }
0x1b00   :  { %v1653_v62 = vpop.permute.xlu0 %1652 }
0x1b01   :  { %3177 = vtanh.f32 %v1656_v60  ;;  %v1657_v63 = vadd.f32 %v1653_v62, %v1637_v61 }
0x1b03   :  { %3179 = vtanh.f32 %v1657_v63 }
0x1b0b   :  { %v3178_v2 = vpop.eup %3177 }
0x1b0c   :  { %1662 = vrot.lane.b32.xlu1 %v3178_v2, %s3379_s26 }
0x1b0d   :  { %v3180_v3 = vpop.eup %3179 }
0x1b0e   :  { %1664 = vrot.lane.b32.xlu0 %v3180_v3, %s3379_s26 }
0x1b7e   :  { %v1663_v8 = vpop.permute.xlu1 %1662 }
0x1b7f   :  { %v3731_v11 = vmul.f32 %v3174_v50, %v1663_v8 }
0x1b80   :  { %v1665_v9 = vpop.permute.xlu0 %1664 }
0x1b81   :  { %v3729_v10 = vmul.f32 %v3176_v54, %v1665_v9 }
0x1b83   :  { %v1682_v12 = vrot.slane %v3729_v10, 7 }
0x1b85   :  { %v1683_v14 = vsel %vm307_vm2, %v1682_v12, %v3731_v11 }
0x1b86   :  { %1684 = vrot.lane.b32.xlu0 %v1683_v14, %s3380_s27 }
0x1bf8   :  { %v1685_v16 = vpop.permute.xlu0 %1684 }
0x1bf9   :  { %2841 = vmatmul.mubr.msk.f32.vlgmr.msra.gmra.mrb[12].mxu0 %vm61_vm1, %v1685_v16 }
0x1bfa   :  { %2988 = vmatpush3.bf16.msra.mxu0 %v3657_v5  ;;  %2862 = vmatprep.mubr.msk.f32.mxu0 %vm3377_vm0, %v3378_v1 }
0x1bfb   :  { %2989 = vmatprep.subr.bf16.mxu0 %v3376_v0 }
0x1bfe   :  { %2991 = vmatpush3.bf16.msra.mxu0 %v3662_v34 }
0x1bff   :  { %2998 = vmatprep.subr.bf16.mxu0 %v3376_v0 }
0x1ccc   :  { %v1754_v18 = vpop.f32.mrb[12].mxu0 }
0x1ccd   :  { %v1759_v19 = vrot.slane %v1754_v18, 1  ;;  %v1762_v20 = vadd.f32 %v1754_v18, %v1680_v17  ;;  %v2842_v21 = vpop.f32.mrb[13].mxu0 }
0x1ccf   :  { %v1763_v23 = vadd.f32 %v1759_v19, %v1681_v22  ;;  %3181 = vtanh.f32 %v1762_v20  ;;  %v2591_v28 = vmul.f32 -1.442695, %v1762_v20 }
0x1cd1   :  { %3183 = vtanh.f32 %v1763_v23  ;;  %v2592_v29 = vmul.f32 -1.442695, %v1763_v23 }
0x1cd2   :  { %3185 = vpow2.f32 %v2591_v28 }
0x1cd3   :  { %3187 = vpow2.f32 %v2592_v29 }
0x1cd9   :  { %v3182_v24 = vpop.eup %3181 }
0x1cda   :  { %1782 = vrot.lane.b32.xlu0 %v3182_v24, %s3379_s26 }
0x1cdb   :  { %v3184_v25 = vpop.eup %3183 }
0x1cdc   :  { %1784 = vrot.lane.b32.xlu1 %v3184_v25, %s3379_s26  ;;  %v3186_v56 = vpop.eup %3185 }
0x1cdd   :  { %v3188_v30 = vpop.eup %3187  ;;  %v1770_v31 = vadd.f32 1.0, %v3186_v56 }
0x1cde   :  { %v1771_v7 = vadd.f32 1.0, %v3188_v30 }
0x1cdf   :  { %3189 = vrcp.f32 %v1770_v31 }
0x1ce0   :  { %3191 = vrcp.f32 %v1771_v7 }
0x1ce9   :  { %v3190_v53 = vpop.eup %3189 }
0x1cea   :  { %v3192_v27 = vpop.eup %3191  ;;  %v1778_v33 = vmul.f32 %v3190_v53, %v1656_v60 }
0x1ceb   :  { %v1779_v37 = vmul.f32 %v3192_v27, %v1657_v63 }
0x1d4c   :  { %v1783_v47 = vpop.permute.xlu0 %1782 }
0x1d4d   :  { %v1788_v46 = vmul.f32 %v3190_v53, %v1783_v47  ;;  %v1964_v47 = vld [vmem:[#allocation3 + $0x4] sm:$0x1] }
0x1d4e   :  { %v1785_v26 = vpop.permute.xlu1 %1784 }
0x1d4f   :  { %1792 = vrot.lane.b32.xlu0 %v1788_v46, %s3380_s27  ;;  %v1789_v32 = vmul.f32 %v3192_v27, %v1785_v26 }
0x1d51   :  { %1794 = vrot.lane.b32.xlu1 %v1789_v32, %s3380_s27 }
0x1dc1   :  { %v1793_v35 = vpop.permute.xlu0 %1792 }
0x1dc2   :  { %v1798_v36 = vadd.f32 %v1793_v35, %v1778_v33  ;;  %v1965_v33 = vld [vmem:[#allocation3 + $0xc] sm:$0x1] }
0x1dc3   :  { %v1795_v38 = vpop.permute.xlu1 %1794 }
0x1dc4   :  { %3193 = vtanh.f32 %v1798_v36  ;;  %v1799_v39 = vadd.f32 %v1795_v38, %v1779_v37 }
0x1dc6   :  { %3195 = vtanh.f32 %v1799_v39 }
0x1dce   :  { %v3194_v40 = vpop.eup %3193 }
0x1dcf   :  { %1804 = vrot.lane.b32.xlu0 %v3194_v40, %s3379_s26 }
0x1dd0   :  { %v3196_v13 = vpop.eup %3195 }
0x1dd1   :  { %1806 = vrot.lane.b32.xlu1 %v3196_v13, %s3379_s26 }
0x1e41   :  { %v1805_v41 = vpop.permute.xlu0 %1804 }
0x1e42   :  { %v3752_v43 = vmul.f32 %v3190_v53, %v1805_v41 }
0x1e43   :  { %v1807_v42 = vpop.permute.xlu1 %1806 }
0x1e44   :  { %v3750_v15 = vmul.f32 %v3192_v27, %v1807_v42 }
0x1e46   :  { %v1824_v44 = vrot.slane %v3750_v15, 7 }
0x1e48   :  { %v1825_v45 = vsel %vm307_vm2, %v1824_v44, %v3752_v43 }
0x1e49   :  { %1826 = vrot.lane.b32.xlu1 %v1825_v45, %s3380_s27 }
0x1ebb   :  { %v1827_v48 = vpop.permute.xlu1 %1826 }
0x1ebc   :  { %2852 = vmatmul.mubr.msk.f32.vlgmr.msra.gmra.mrb[12].mxu1 %vm61_vm1, %v1827_v48 }
0x1ebd   :  { %2994 = vmatpush3.bf16.msra.mxu1 %v3657_v5  ;;  %2873 = vmatprep.mubr.msk.f32.mxu1 %vm3377_vm0, %v3378_v1 }
0x1ebe   :  { %2995 = vmatprep.subr.bf16.mxu1 %v3376_v0 }
0x1ec1   :  { %2997 = vmatpush3.bf16.msra.mxu1 %v3662_v34 }
0x1ec2   :  { %3004 = vmatprep.subr.bf16.mxu1 %v3376_v0 }
0x1f8f   :  { %v1896_v50 = vpop.f32.mrb[12].mxu1 }
0x1f90   :  { %v1901_v51 = vrot.slane %v1896_v50, 1  ;;  %v1904_v52 = vadd.f32 %v1896_v50, %v1822_v49  ;;  %v2853_v54 = vpop.f32.mrb[13].mxu1 }
0x1f92   :  { %v1905_v57 = vadd.f32 %v1901_v51, %v1823_v55  ;;  %3197 = vtanh.f32 %v1904_v52  ;;  %v2594_v60 = vmul.f32 -1.442695, %v1904_v52 }
0x1f94   :  { %3199 = vtanh.f32 %v1905_v57  ;;  %v2595_v61 = vmul.f32 -1.442695, %v1905_v57 }
0x1f95   :  { %3201 = vpow2.f32 %v2594_v60 }
0x1f96   :  { %3203 = vpow2.f32 %v2595_v61 }
0x1f9c   :  { %v3198_v58 = vpop.eup %3197 }
0x1f9d   :  { %1924 = vrot.lane.b32.xlu1 %v3198_v58, %s3379_s26 }
0x1f9e   :  { %v3200_v59 = vpop.eup %3199 }
0x1f9f   :  { %1926 = vrot.lane.b32.xlu0 %v3200_v59, %s3379_s26  ;;  %v3202_v62 = vpop.eup %3201 }
0x1fa0   :  { %v3204_v63 = vpop.eup %3203  ;;  %v1912_v2 = vadd.f32 1.0, %v3202_v62 }
0x1fa1   :  { %v1913_v3 = vadd.f32 1.0, %v3204_v63 }
0x1fa2   :  { %3205 = vrcp.f32 %v1912_v2 }
0x1fa3   :  { %3207 = vrcp.f32 %v1913_v3 }
0x1fac   :  { %v3206_v8 = vpop.eup %3205 }
0x1fad   :  { %v3208_v14 = vpop.eup %3207  ;;  %v1920_v18 = vmul.f32 %v3206_v8, %v1798_v36 }
0x1fae   :  { %v1921_v21 = vmul.f32 %v3208_v14, %v1799_v39 }
0x200f   :  { %v1925_v9 = vpop.permute.xlu1 %1924 }
0x2010   :  { %v1930_v12 = vmul.f32 %v3206_v8, %v1925_v9 }
0x2011   :  { %v1927_v16 = vpop.permute.xlu0 %1926 }
0x2012   :  { %1934 = vrot.lane.b32.xlu1 %v1930_v12, %s3380_s27  ;;  %v1931_v17 = vmul.f32 %v3208_v14, %v1927_v16 }
0x2014   :  { %1936 = vrot.lane.b32.xlu0 %v1931_v17, %s3380_s27 }
0x2084   :  { %v1935_v19 = vpop.permute.xlu1 %1934 }
0x2085   :  { %v1940_v20 = vadd.f32 %v1935_v19, %v1920_v18 }
0x2086   :  { %v1937_v22 = vpop.permute.xlu0 %1936 }
0x2087   :  { %3209 = vtanh.f32 %v1940_v20  ;;  %v1941_v23 = vadd.f32 %v1937_v22, %v1921_v21 }
0x2089   :  { %3211 = vtanh.f32 %v1941_v23 }
0x2091   :  { %v3210_v24 = vpop.eup %3209 }
0x2092   :  { %1946 = vrot.lane.b32.xlu1 %v3210_v24, %s3379_s26 }
0x2093   :  { %v3212_v25 = vpop.eup %3211 }
0x2094   :  { %1948 = vrot.lane.b32.xlu0 %v3212_v25, %s3379_s26 }
0x2104   :  { %v1947_v28 = vpop.permute.xlu1 %1946 }
0x2105   :  { %v3773_v30 = vmul.f32 %v3206_v8, %v1947_v28 }
0x2106   :  { %v1949_v29 = vpop.permute.xlu0 %1948 }
0x2107   :  { %v3771_v56 = vmul.f32 %v3208_v14, %v1949_v29  ;;  %v2106_v14 = vld [vmem:[#allocation3 + $0x5] sm:$0x1] }
0x2109   :  { %v1966_v31 = vrot.slane %v3771_v56, 7 }
0x210b   :  { %v1967_v7 = vsel %vm307_vm2, %v1966_v31, %v3773_v30 }
0x210c   :  { %1968 = vrot.lane.b32.xlu0 %v1967_v7, %s3380_s27 }
0x217e   :  { %v1969_v53 = vpop.permute.xlu0 %1968 }
0x217f   :  { %2863 = vmatmul.mubr.msk.f32.vlgmr.msra.gmra.mrb[14].mxu0 %vm61_vm1, %v1969_v53 }
0x2180   :  { %3000 = vmatpush3.bf16.msra.mxu0 %v3657_v5  ;;  %2884 = vmatprep.mubr.msk.f32.mxu0 %vm3377_vm0, %v3378_v1 }
0x2181   :  { %3001 = vmatprep.subr.bf16.mxu0 %v3376_v0 }
0x2184   :  { %3003 = vmatpush3.bf16.msra.mxu0 %v3662_v34 }
0x2252   :  { %v2038_v46 = vpop.f32.mrb[14].mxu0 }
0x2253   :  { %v2043_v27 = vrot.slane %v2038_v46, 1  ;;  %v2046_v26 = vadd.f32 %v2038_v46, %v1964_v47  ;;  %v2864_v32 = vpop.f32.mrb[15].mxu0 }
0x2255   :  { %v2047_v35 = vadd.f32 %v2043_v27, %v1965_v33  ;;  %3213 = vtanh.f32 %v2046_v26  ;;  %v2597_v38 = vmul.f32 -1.442695, %v2046_v26 }
0x2257   :  { %3215 = vtanh.f32 %v2047_v35  ;;  %v2598_v39 = vmul.f32 -1.442695, %v2047_v35 }
0x2258   :  { %3217 = vpow2.f32 %v2597_v38 }
0x2259   :  { %3219 = vpow2.f32 %v2598_v39 }
0x225f   :  { %v3214_v36 = vpop.eup %3213 }
0x2260   :  { %2066 = vrot.lane.b32.xlu0 %v3214_v36, %s3379_s26 }
0x2261   :  { %v3216_v37 = vpop.eup %3215 }
0x2262   :  { %2068 = vrot.lane.b32.xlu1 %v3216_v37, %s3379_s26  ;;  %v3218_v40 = vpop.eup %3217 }
0x2263   :  { %v3220_v13 = vpop.eup %3219  ;;  %v2054_v41 = vadd.f32 1.0, %v3218_v40 }
0x2264   :  { %v2055_v42 = vadd.f32 1.0, %v3220_v13 }
0x2265   :  { %3221 = vrcp.f32 %v2054_v41 }
0x2266   :  { %3223 = vrcp.f32 %v2055_v42 }
0x226f   :  { %v3222_v44 = vpop.eup %3221 }
0x2270   :  { %v3224_v49 = vpop.eup %3223  ;;  %v2062_v52 = vmul.f32 %v3222_v44, %v1940_v20  ;;  %v2107_v20 = vld [vmem:[#allocation3 + $0xd] sm:$0x1] }
0x2271   :  { %v2063_v57 = vmul.f32 %v3224_v49, %v1941_v23 }
0x22d2   :  { %v2067_v45 = vpop.permute.xlu0 %2066 }
0x22d3   :  { %v2072_v48 = vmul.f32 %v3222_v44, %v2067_v45  ;;  %v2248_v45 = vld [vmem:[#allocation3 + $0x6] sm:$0x1] }
0x22d4   :  { %v2069_v50 = vpop.permute.xlu1 %2068 }
0x22d5   :  { %2076 = vrot.lane.b32.xlu0 %v2072_v48, %s3380_s27  ;;  %v2073_v51 = vmul.f32 %v3224_v49, %v2069_v50 }
0x22d7   :  { %2078 = vrot.lane.b32.xlu1 %v2073_v51, %s3380_s27 }
0x2347   :  { %v2077_v54 = vpop.permute.xlu0 %2076 }
0x2348   :  { %v2082_v55 = vadd.f32 %v2077_v54, %v2062_v52  ;;  %v2249_v52 = vld [vmem:[#allocation3 + $0xe] sm:$0x1] }
0x2349   :  { %v2079_v58 = vpop.permute.xlu1 %2078 }
0x234a   :  { %3225 = vtanh.f32 %v2082_v55  ;;  %v2083_v59 = vadd.f32 %v2079_v58, %v2063_v57 }
0x234c   :  { %3227 = vtanh.f32 %v2083_v59 }
0x2354   :  { %v3226_v60 = vpop.eup %3225 }
0x2355   :  { %2088 = vrot.lane.b32.xlu0 %v3226_v60, %s3379_s26 }
0x2356   :  { %v3228_v61 = vpop.eup %3227 }
0x2357   :  { %2090 = vrot.lane.b32.xlu1 %v3228_v61, %s3379_s26 }
0x23c7   :  { %v2089_v62 = vpop.permute.xlu0 %2088 }
0x23c8   :  { %v3793_v3 = vmul.f32 %v3222_v44, %v2089_v62 }
0x23c9   :  { %v2091_v63 = vpop.permute.xlu1 %2090 }
0x23ca   :  { %v3791_v2 = vmul.f32 %v3224_v49, %v2091_v63 }
0x23cc   :  { %v2108_v8 = vrot.slane %v3791_v2, 7 }
0x23ce   :  { %v2109_v9 = vsel %vm307_vm2, %v2108_v8, %v3793_v3 }
0x23cf   :  { %2110 = vrot.lane.b32.xlu1 %v2109_v9, %s3380_s27 }
0x2441   :  { %v2111_v12 = vpop.permute.xlu1 %2110 }
0x2442   :  { %2874 = vmatmul.mubr.msk.f32.vlgmr.msra.gmra.mrb[14].mxu1 %vm61_vm1, %v2111_v12 }
0x2443   :  { %3006 = vmatpush3.bf16.msra.mxu1 %v3657_v5  ;;  %2895 = vmatprep.mubr.msk.f32.mxu1 %vm3377_vm0, %v3378_v1 }
0x2444   :  { %3007 = vmatprep.subr.bf16.mxu1 %v3376_v0 }
0x2447   :  { %3009 = vmatpush3.bf16.msra.mxu1 %v3662_v34 }
0x2515   :  { %v2180_v16 = vpop.f32.mrb[14].mxu1 }
0x2516   :  { %v2185_v17 = vrot.slane %v2180_v16, 1  ;;  %v2188_v18 = vadd.f32 %v2180_v16, %v2106_v14  ;;  %v2875_v19 = vpop.f32.mrb[15].mxu1 }
0x2518   :  { %v2189_v21 = vadd.f32 %v2185_v17, %v2107_v20  ;;  %3229 = vtanh.f32 %v2188_v18  ;;  %v2600_v1 = vmul.f32 -1.442695, %v2188_v18 }
0x251a   :  { %3231 = vtanh.f32 %v2189_v21  ;;  %v2601_v23 = vmul.f32 -1.442695, %v2189_v21 }
0x251b   :  { %3233 = vpow2.f32 %v2600_v1 }
0x251c   :  { %3235 = vpow2.f32 %v2601_v23 }
0x2522   :  { %v3230_v22 = vpop.eup %3229 }
0x2523   :  { %2208 = vrot.lane.b32.xlu1 %v3230_v22, %s3379_s26 }
0x2524   :  { %v3232_v5 = vpop.eup %3231 }
0x2525   :  { %2210 = vrot.lane.b32.xlu0 %v3232_v5, %s3379_s26  ;;  %v3234_v0 = vpop.eup %3233 }
0x2526   :  { %v3236_v34 = vpop.eup %3235  ;;  %v2196_v24 = vadd.f32 1.0, %v3234_v0 }
0x2527   :  { %v2197_v25 = vadd.f32 1.0, %v3236_v34 }
0x2528   :  { %3237 = vrcp.f32 %v2196_v24 }
0x2529   :  { %3239 = vrcp.f32 %v2197_v25 }
0x2532   :  { %v3238_v28 = vpop.eup %3237 }
0x2533   :  { %v3240_v7 = vpop.eup %3239  ;;  %v2204_v46 = vmul.f32 %v3238_v28, %v2082_v55 }
0x2534   :  { %v2205_v32 = vmul.f32 %v3240_v7, %v2083_v59 }
0x2595   :  { %v2209_v29 = vpop.permute.xlu1 %2208 }
0x2596   :  { %v2214_v31 = vmul.f32 %v3238_v28, %v2209_v29 }
0x2597   :  { %v2211_v53 = vpop.permute.xlu0 %2210 }
0x2598   :  { %2218 = vrot.lane.b32.xlu1 %v2214_v31, %s3380_s27  ;;  %v2215_v47 = vmul.f32 %v3240_v7, %v2211_v53 }
0x259a   :  { %2220 = vrot.lane.b32.xlu0 %v2215_v47, %s3380_s27 }
0x260a   :  { %v2219_v27 = vpop.permute.xlu1 %2218 }
0x260b   :  { %v2224_v26 = vadd.f32 %v2219_v27, %v2204_v46 }
0x260c   :  { %v2221_v33 = vpop.permute.xlu0 %2220 }
0x260d   :  { %3241 = vtanh.f32 %v2224_v26  ;;  %v2225_v35 = vadd.f32 %v2221_v33, %v2205_v32 }
0x260f   :  { %3243 = vtanh.f32 %v2225_v35 }
0x2617   :  { %v3242_v36 = vpop.eup %3241 }
0x2618   :  { %2230 = vrot.lane.b32.xlu1 %v3242_v36, %s3379_s26 }
0x2619   :  { %v3244_v37 = vpop.eup %3243 }
0x261a   :  { %2232 = vrot.lane.b32.xlu0 %v3244_v37, %s3379_s26 }
0x268a   :  { %v2231_v38 = vpop.permute.xlu1 %2230 }
0x268b   :  { %v3813_v13 = vmul.f32 %v3238_v28, %v2231_v38 }
0x268c   :  { %v2233_v39 = vpop.permute.xlu0 %2232 }
0x268d   :  { %v3811_v40 = vmul.f32 %v3240_v7, %v2233_v39  ;;  %v2390_v7 = vld [vmem:[#allocation3 + $0x7] sm:$0x1] }
0x268f   :  { %v2250_v41 = vrot.slane %v3811_v40, 7 }
0x2691   :  { %v2251_v42 = vsel %vm307_vm2, %v2250_v41, %v3813_v13 }
0x2692   :  { %2252 = vrot.lane.b32.xlu0 %v2251_v42, %s3380_s27 }
0x2704   :  { %v2253_v44 = vpop.permute.xlu0 %2252 }
0x2705   :  { %2885 = vmatmul.mubr.msk.f32.vlgmr.msra.gmra.mrb[16].mxu0 %vm61_vm1, %v2253_v44 }
0x27d8   :  { %v2322_v48 = vpop.f32.mrb[16].mxu0 }
0x27d9   :  { %v2327_v49 = vrot.slane %v2322_v48, 1  ;;  %v2330_v50 = vadd.f32 %v2322_v48, %v2248_v45  ;;  %v2886_v51 = vpop.f32.mrb[17].mxu0 }
0x27db   :  { %v2331_v54 = vadd.f32 %v2327_v49, %v2249_v52  ;;  %3245 = vtanh.f32 %v2330_v50  ;;  %v2603_v58 = vmul.f32 -1.442695, %v2330_v50 }
0x27dd   :  { %3247 = vtanh.f32 %v2331_v54  ;;  %v2604_v59 = vmul.f32 -1.442695, %v2331_v54 }
0x27de   :  { %3249 = vpow2.f32 %v2603_v58 }
0x27df   :  { %3251 = vpow2.f32 %v2604_v59 }
0x27e5   :  { %v3246_v55 = vpop.eup %3245 }
0x27e6   :  { %2350 = vrot.lane.b32.xlu0 %v3246_v55, %s3379_s26 }
0x27e7   :  { %v3248_v57 = vpop.eup %3247 }
0x27e8   :  { %2352 = vrot.lane.b32.xlu1 %v3248_v57, %s3379_s26  ;;  %v3250_v60 = vpop.eup %3249 }
0x27e9   :  { %v3252_v61 = vpop.eup %3251  ;;  %v2338_v62 = vadd.f32 1.0, %v3250_v60 }
0x27ea   :  { %v2339_v63 = vadd.f32 1.0, %v3252_v61 }
0x27eb   :  { %3253 = vrcp.f32 %v2338_v62 }
0x27ec   :  { %3255 = vrcp.f32 %v2339_v63 }
0x27f5   :  { %v3254_v8 = vpop.eup %3253 }
0x27f6   :  { %v3256_v14 = vpop.eup %3255  ;;  %v2346_v18 = vmul.f32 %v3254_v8, %v2224_v26  ;;  %v2391_v26 = vld [vmem:[#allocation3 + $0xf] sm:$0x1] }
0x27f7   :  { %v2347_v21 = vmul.f32 %v3256_v14, %v2225_v35 }
0x2858   :  { %v2351_v9 = vpop.permute.xlu0 %2350 }
0x2859   :  { %v2356_v12 = vmul.f32 %v3254_v8, %v2351_v9 }
0x285a   :  { %v2353_v16 = vpop.permute.xlu1 %2352 }
0x285b   :  { %2360 = vrot.lane.b32.xlu0 %v2356_v12, %s3380_s27  ;;  %v2357_v17 = vmul.f32 %v3256_v14, %v2353_v16 }
0x285d   :  { %2362 = vrot.lane.b32.xlu1 %v2357_v17, %s3380_s27 }
0x28cd   :  { %v2361_v19 = vpop.permute.xlu0 %2360 }
0x28ce   :  { %v2366_v20 = vadd.f32 %v2361_v19, %v2346_v18 }
0x28cf   :  { %v2363_v22 = vpop.permute.xlu1 %2362 }
0x28d0   :  { %3257 = vtanh.f32 %v2366_v20  ;;  %v2367_v5 = vadd.f32 %v2363_v22, %v2347_v21 }
0x28d2   :  { %3259 = vtanh.f32 %v2367_v5 }
0x28da   :  { %v3258_v1 = vpop.eup %3257 }
0x28db   :  { %2372 = vrot.lane.b32.xlu0 %v3258_v1, %s3379_s26 }
0x28dc   :  { %v3260_v23 = vpop.eup %3259 }
0x28dd   :  { %2374 = vrot.lane.b32.xlu1 %v3260_v23, %s3379_s26 }
0x294d   :  { %v2373_v0 = vpop.permute.xlu0 %2372 }
0x294e   :  { %v2378_v25 = vmul.f32 %v3254_v8, %v2373_v0 }
0x294f   :  { %v2375_v34 = vpop.permute.xlu1 %2374 }
0x2950   :  { %v2379_v24 = vmul.f32 %v3256_v14, %v2375_v34 }
0x2952   :  { %v2392_v28 = vrot.slane %v2379_v24, 7 }
0x2954   :  { %v2393_v29 = vsel %vm307_vm2, %v2392_v28, %v2378_v25 }
0x2955   :  { %2394 = vrot.lane.b32.xlu1 %v2393_v29, %s3380_s27 }
0x29c7   :  { %v2395_v31 = vpop.permute.xlu1 %2394 }
0x29c8   :  { %2896 = vmatmul.mubr.msk.f32.vlgmr.msra.gmra.mrb[16].mxu1 %vm61_vm1, %v2395_v31 }
0x2a9b   :  { %v2464_v53 = vpop.f32.mrb[16].mxu1 }
0x2a9c   :  { %v2469_v47 = vrot.slane %v2464_v53, 1  ;;  %v2472_v46 = vadd.f32 %v2464_v53, %v2390_v7  ;;  %v2897_v27 = vpop.f32.mrb[17].mxu1 }
0x2a9e   :  { %v2473_v32 = vadd.f32 %v2469_v47, %v2391_v26  ;;  %3261 = vtanh.f32 %v2472_v46  ;;  %v2606_v36 = vmul.f32 -1.442695, %v2472_v46 }
0x2aa0   :  { %3263 = vtanh.f32 %v2473_v32  ;;  %v2607_v37 = vmul.f32 -1.442695, %v2473_v32 }
0x2aa1   :  { %3265 = vpow2.f32 %v2606_v36 }
0x2aa2   :  { %3267 = vpow2.f32 %v2607_v37 }
0x2aa8   :  { %v3262_v33 = vpop.eup %3261 }
0x2aa9   :  { %2492 = vrot.lane.b32.xlu1 %v3262_v33, %s3379_s26 }
0x2aaa   :  { %v3264_v35 = vpop.eup %3263 }
0x2aab   :  { %2494 = vrot.lane.b32.xlu0 %v3264_v35, %s3379_s26  ;;  %v3266_v38 = vpop.eup %3265 }
0x2aac   :  { %v3268_v39 = vpop.eup %3267  ;;  %v2480_v41 = vadd.f32 1.0, %v3266_v38 }
0x2aad   :  { %v2481_v42 = vadd.f32 1.0, %v3268_v39 }
0x2aae   :  { %3269 = vrcp.f32 %v2480_v41 }
0x2aaf   :  { %3271 = vrcp.f32 %v2481_v42 }
0x2ab8   :  { %v3270_v44 = vpop.eup %3269 }
0x2ab9   :  { %v3272_v49 = vpop.eup %3271  ;;  %v2488_v52 = vmul.f32 %v3270_v44, %v2366_v20 }
0x2aba   :  { %v2489_v57 = vmul.f32 %v3272_v49, %v2367_v5 }
0x2b1b   :  { %v2493_v45 = vpop.permute.xlu1 %2492 }
0x2b1c   :  { %v2498_v48 = vmul.f32 %v3270_v44, %v2493_v45 }
0x2b1d   :  { %v2495_v50 = vpop.permute.xlu0 %2494 }
0x2b1e   :  { %2502 = vrot.lane.b32.xlu1 %v2498_v48, %s3380_s27  ;;  %v2499_v51 = vmul.f32 %v3272_v49, %v2495_v50 }
0x2b20   :  { %2504 = vrot.lane.b32.xlu0 %v2499_v51, %s3380_s27 }
0x2b90   :  { %v2503_v54 = vpop.permute.xlu1 %2502 }
0x2b91   :  { %v2508_v55 = vadd.f32 %v2503_v54, %v2488_v52 }
0x2b92   :  { %v2505_v58 = vpop.permute.xlu0 %2504 }
0x2b93   :  { %3273 = vtanh.f32 %v2508_v55  ;;  %v2509_v59 = vadd.f32 %v2505_v58, %v2489_v57 }
0x2b95   :  { %3275 = vtanh.f32 %v2509_v59 }
0x2b9d   :  { %v3274_v60 = vpop.eup %3273 }
0x2b9e   :  { %2514 = vrot.lane.b32.xlu1 %v3274_v60, %s3379_s26 }
0x2b9f   :  { %v3276_v61 = vpop.eup %3275 }
0x2ba0   :  { %2516 = vrot.lane.b32.xlu0 %v3276_v61, %s3379_s26 }
0x2ba2   :  { %1530 = vrot.lane.b32.xlu1 %v3710_v4, %s3380_s27 }
0x2ba4   :  { %1532 = vrot.lane.b32.xlu0 %v3708_v6, %s3380_s27 }
0x2ba6   :  { %1672 = vrot.lane.b32.xlu1 %v3731_v11, %s3380_s27 }
0x2ba8   :  { %1674 = vrot.lane.b32.xlu0 %v3729_v10, %s3380_s27 }
0x2baa   :  { %1814 = vrot.lane.b32.xlu1 %v3752_v43, %s3380_s27 }
0x2bac   :  { %1816 = vrot.lane.b32.xlu0 %v3750_v15, %s3380_s27 }
0x2bae   :  { %1956 = vrot.lane.b32.xlu1 %v3773_v30, %s3380_s27 }
0x2bb0   :  { %1958 = vrot.lane.b32.xlu0 %v3771_v56, %s3380_s27 }
0x2bb2   :  { %2098 = vrot.lane.b32.xlu1 %v3793_v3, %s3380_s27 }
0x2bb4   :  { %2100 = vrot.lane.b32.xlu0 %v3791_v2, %s3380_s27 }
0x2bb6   :  { %2240 = vrot.lane.b32.xlu1 %v3813_v13, %s3380_s27 }
0x2bb8   :  { %2242 = vrot.lane.b32.xlu0 %v3811_v40, %s3380_s27 }
0x2bba   :  { %2382 = vrot.lane.b32.xlu1 %v2378_v25, %s3380_s27 }
0x2bbc   :  { %2384 = vrot.lane.b32.xlu0 %v2379_v24, %s3380_s27 }
0x2c10   :  { %v2515_v6 = vpop.permute.xlu1 %2514 }
0x2c11   :  { %v2520_v4 = vmul.f32 %v3270_v44, %v2515_v6 }
0x2c12   :  { %v2517_v10 = vpop.permute.xlu0 %2516 }
0x2c13   :  { %2524 = vrot.lane.b32.xlu1 %v2520_v4, %s3380_s27  ;;  %v2521_v11 = vmul.f32 %v3272_v49, %v2517_v10 }
0x2c14   :  { %v1531_v15 = vpop.permute.xlu1 %1530 }
0x2c15   :  { %1536 = vst.msk [vmem:[#allocation2] sm:$0x1] %vm301_vm3, %v1531_v15  ;;  %v2532_v43 = vrot.slane %v2521_v11, 7 }
0x2c16   :  { %v1533_v56 = vpop.permute.xlu0 %1532 }
0x2c17   :  { %1537 = vst.msk [vmem:[#allocation2 + $0x8] sm:$0x1] %vm301_vm3, %v1533_v56  ;;  %v2533_v2 = vsel %vm307_vm2, %v2532_v43, %v2520_v4 }
0x2c18   :  { %v1673_v30 = vpop.permute.xlu1 %1672  ;;  %2534 = vrot.lane.b32.xlu0 %v2533_v2, %s3380_s27 }
0x2c19   :  { %1678 = vst.msk [vmem:[#allocation2 + $0x1] sm:$0x1] %vm301_vm3, %v1673_v30 }
0x2c1a   :  { %v1675_v3 = vpop.permute.xlu0 %1674 }
0x2c1b   :  { %1679 = vst.msk [vmem:[#allocation2 + $0x9] sm:$0x1] %vm301_vm3, %v1675_v3 }
0x2c1c   :  { %v1815_v40 = vpop.permute.xlu1 %1814  ;;  %2526 = vrot.lane.b32.xlu0 %v2521_v11, %s3380_s27 }
0x2c1d   :  { %1820 = vst.msk [vmem:[#allocation2 + $0x2] sm:$0x1] %vm301_vm3, %v1815_v40 }
0x2c1e   :  { %v1817_v13 = vpop.permute.xlu0 %1816 }
0x2c1f   :  { %1821 = vst.msk [vmem:[#allocation2 + $0xa] sm:$0x1] %vm301_vm3, %v1817_v13 }
0x2c20   :  { %v1957_v62 = vpop.permute.xlu1 %1956 }
0x2c21   :  { %1962 = vst.msk [vmem:[#allocation2 + $0x3] sm:$0x1] %vm301_vm3, %v1957_v62 }
0x2c22   :  { %v1959_v63 = vpop.permute.xlu0 %1958 }
0x2c23   :  { %1963 = vst.msk [vmem:[#allocation2 + $0xb] sm:$0x1] %vm301_vm3, %v1959_v63 }
0x2c24   :  { %v2099_v8 = vpop.permute.xlu1 %2098 }
0x2c25   :  { %2104 = vst.msk [vmem:[#allocation2 + $0x4] sm:$0x1] %vm301_vm3, %v2099_v8 }
0x2c26   :  { %v2101_v9 = vpop.permute.xlu0 %2100 }
0x2c27   :  { %2105 = vst.msk [vmem:[#allocation2 + $0xc] sm:$0x1] %vm301_vm3, %v2101_v9 }
0x2c28   :  { %v2241_v12 = vpop.permute.xlu1 %2240 }
0x2c29   :  { %2246 = vst.msk [vmem:[#allocation2 + $0x5] sm:$0x1] %vm301_vm3, %v2241_v12 }
0x2c2a   :  { %v2243_v14 = vpop.permute.xlu0 %2242 }
0x2c2b   :  { %2247 = vst.msk [vmem:[#allocation2 + $0xd] sm:$0x1] %vm301_vm3, %v2243_v14 }
0x2c2c   :  { %v2383_v16 = vpop.permute.xlu1 %2382 }
0x2c2d   :  { %2388 = vst.msk [vmem:[#allocation2 + $0x6] sm:$0x1] %vm301_vm3, %v2383_v16 }
0x2c2e   :  { %v2385_v17 = vpop.permute.xlu0 %2384 }
0x2c2f   :  { %2389 = vst.msk [vmem:[#allocation2 + $0xe] sm:$0x1] %vm301_vm3, %v2385_v17 }
0x2c85   :  { %v2525_v18 = vpop.permute.xlu1 %2524 }
0x2c86   :  { %2530 = vst.msk [vmem:[#allocation2 + $0x7] sm:$0x1] %vm301_vm3, %v2525_v18 }
0x2c8a   :  { %v2535_v19 = vpop.permute.xlu0 %2534 }
0x2c8b   :  { %2538 = vst.msk [vmem:[#allocation10] sm:$0x3] %vm2537_vm4, %v2535_v19 }
0x2c8c   :  { %3354 = shalt.err (!%p3351_p0)
}
0x2c8d   :  { %s3355_s8 = scalar_lea.hbm %s3897_s4, 32 }
0x2c8e   :  { %p3356_p1 = scmp.ne.s32.totalorder %s3897_s4, %s3355_s8  ;;  %p3359_p2 = scmp.lt.u32.totalorder %s3355_s8, %s3897_s4 }
0x2c90   :  { %p3361_p3 = pnand %p3359_p2, %p3356_p1 }
0x2c92   :  { %3364 = shalt.err (!%p3361_p3)
}
0x2c93   :  { %2548 = dma.vmem_to_hbm [thread:$0]  %s2546_s30, 32, %s3897_s4, [#allocation6]   ;;  %v2527_v20 = vpop.permute.xlu0 %2526 }
0x2c94   :  { %2531 = vst.msk [vmem:[#allocation2 + $0xf] sm:$0x1] %vm301_vm3, %v2527_v20 }
0x2c95   :  { %3369 = dma.done.wait [#allocation6], 32  }
0x2c96   :  { %3370 = vsyncadd [#allocation6], 4294967264 }
0x2c97   :  { %2552 = vsyncpa [#allocation5], 1 }
0x2c98   :  { %2553 = vsyncpa [#allocation8], 1 }
0x2c99   :  { %2554 = vsyncpa [#allocation6], 1 }

</bundles_post_ra>
